<compile_context>
chip_gen: v5e
topology: v5e:2x2
jax: 0.10.0
libtpu: 0.0.40
codegen_flags: <defaults>
</compile_context>

<pallas_src>
import jax
import jax.numpy as jnp
from jax.experimental import pallas as pl
from jax.experimental.pallas import tpu as pltpu

PATCH = 4          # stand-in backbone downsample factor (latents at 1/4 input res)
TAIL_DIM = 512     # out_dim of UResNet50 tail in the reference module
N_CENTROIDS = 16   # k-means centroid count (checkpoint dependent; synthetic here)
MASK_SCALES = (0.125, 0.25, 0.5, 1.0)


def _kmeans_label_kernel(patch_ref, wc_ref, const_ref, label_ref):
    # patch_ref: (TN, Dp) bf16   wc_ref: (Dp, K) bf16   const_ref: (1, K) f32
    # label_ref: (1, 1, TN) int32   (lane-dense output slab)
    #
    # Folded projection + kmeans_predict: with latents = x W + b,
    #   ||latents - c||^2  argmin  ==  argmin( ||c||^2 - 2 b.c - 2 x.(W C^T) )
    # (per-row ||latents||^2 constant dropped; argmin unchanged).
    xc = jnp.dot(patch_ref[...], wc_ref[...],
                 preferred_element_type=jnp.float32)            # (TN, K) f32 acc
    scores = const_ref[...] - 2.0 * xc                          # (TN, K)
    k = scores.shape[-1]
    # first-occurrence argmin (matches torch.argmin semantics)
    min_val = jnp.min(scores, axis=-1, keepdims=True)
    idx = jax.lax.broadcasted_iota(jnp.int32, scores.shape, 1)
    cand = jnp.where(scores == min_val, idx, jnp.int32(k))
    labels = jnp.min(cand, axis=-1)                             # (TN,)
    # single (TN,)->(1,TN) relayout goes to the XLU (has slack); keeps the
    # writeback store unmasked / lane-dense.
    label_ref[...] = labels.reshape(1, 1, -1)


def _pick_tile_n(n, cap=1024):
    """Largest tile (multiple of 8, divides n, <= cap) preferring >=2 grid steps."""
    divs = [t for t in range(8, min(cap, n) + 1, 8) if n % t == 0]
    assert divs, f"row count {n} must be a multiple of 8"
    multi = [t for t in divs if n // t >= 2]   # >=2 steps -> both v7x TCs busy
    return max(multi) if multi else max(divs)


def backbone_kmeans(patches, w, b, centroids, *, tile_n=None):
    n, dp = patches.shape
    k, c = centroids.shape
    if tile_n is None:
        tile_n = _pick_tile_n(n)
    assert n % tile_n == 0, "row count must tile evenly"
    n_tiles = n // tile_n

    # Fold the linear projection into the centroid matmul (exact for argmin).
    ct = centroids.T                                              # (C, K)
    wc = jnp.dot(w, ct)                                           # (Dp, K) f32
    const = (jnp.sum(centroids * centroids, axis=1)[None, :]
             - 2.0 * jnp.dot(b[None, :], ct))                     # (1, K) f32

    # bf16 matmul inputs, f32 accumulation (MXU fast path, half the DMA bytes).
    patches_bf = patches.astype(jnp.bfloat16)
    wc_bf = wc.astype(jnp.bfloat16)

    labels = pl.pallas_call(
        _kmeans_label_kernel,
        out_shape=jax.ShapeDtypeStruct((n_tiles, 1, tile_n), jnp.int32),
        grid_spec=pltpu.PrefetchScalarGridSpec(
            num_scalar_prefetch=0,
            grid=(n_tiles,),
            in_specs=[
                pl.BlockSpec((tile_n, dp), lambda i: (i, 0)),
                # grid-invariant operands (tiny: Dp*K and 1*K); default
                # double-buffering costs only a few KB, so left as-is.
                pl.BlockSpec((dp, k), lambda i: (0, 0)),
                pl.BlockSpec((1, k), lambda i: (0, 0)),
            ],
            out_specs=pl.BlockSpec((1, 1, tile_n), lambda i: (i, 0, 0)),
        ),
        compiler_params=pltpu.CompilerParams(
            dimension_semantics=("parallel",),
            # Working set per step is ~tile_n*Dp*2B double-buffered plus tiny
            # invariants; 32 MiB is comfortably inside v7x's 64 MiB physical VMEM.
            vmem_limit_bytes=32 << 20,
        ),
    )(patches_bf, wc_bf, const)
    return labels.reshape(n)


def uresnet_mask_producer_forward(x, params):
    """Reproduces UResnetMaskProducer.forward semantics.

    Returns a dict {dim_w: int mask of shape (b, 1, dim_h, dim_w)}.
    """
    b, cin, H, W = x.shape
    P = PATCH
    h, w = H // P, W // P

    # TODO(synk): the pretrained UResNet50 backbone is checkpoint-loaded and has
    # no clean in-script equivalent; it is replaced by a deterministic linear
    # patch-embed to TAIL_DIM channels (then folded into the centroid matmul).
    # kmeans_predict + nearest interpolation semantics are reproduced exactly.
    #
    # NOTE: the NCHW 6-D patchify transpose is kept for PyTorch input fidelity;
    # since the projection is linear, a column permutation of `w` would let an
    # NHWC input be patchified by plain reshape if layout freedom existed.
    patches = x.reshape(b, cin, h, P, w, P).transpose(0, 2, 4, 1, 3, 5)
    patches = patches.reshape(b * h * w, cin * P * P)   # rows ordered (b, h, w)

    labels = backbone_kmeans(patches, params["w"], params["b"], params["centroids"])
    # kmeans_predict(...).float().reshape(b, 1, h, w)
    masks = labels.astype(jnp.float32).reshape(b, 1, h, w)

    interpolated_masks = {}
    for sf in MASK_SCALES:
        dim_h, dim_w = int(sf * H), int(sf * W)
        # F.interpolate(mode='nearest'): src_index = floor(dst_index * in / out)
        idx_h = (jnp.arange(dim_h) * h) // dim_h
        idx_w = (jnp.arange(dim_w) * w) // dim_w
        imask = masks[:, :, idx_h[:, None], idx_w[None, :]]
        # torch .long() == int64; JAX x64 is disabled so int32 is used here
        interpolated_masks[dim_w] = imask.astype(jnp.int32)
    return interpolated_masks


if __name__ == "__main__":
    key = jax.random.PRNGKey(0)
    k1, k2, k3, k4 = jax.random.split(key, 4)

    # Small but non-degenerate: 512 label rows -> tile_n=256 (lane-dense output,
    # 2 parallel grid steps so both v7x TensorCores get work).
    B, CIN, H, W = 2, 3, 64, 64
    x = jax.random.normal(k1, (B, CIN, H, W), jnp.float32)

    dp = CIN * PATCH * PATCH
    params = {
        "w": jax.random.normal(k2, (dp, TAIL_DIM), jnp.float32) * 0.05,
        "b": jax.random.normal(k3, (TAIL_DIM,), jnp.float32) * 0.01,
        "centroids": jax.random.normal(k4, (N_CENTROIDS, TAIL_DIM), jnp.float32),
    }

    out = uresnet_mask_producer_forward(x, params)
    for v in out.values():
        jax.block_until_ready(v)

    # sanity: expected keys / shapes / label range
    assert sorted(out.keys()) == [8, 16, 32, 64]
    assert out[64].shape == (B, 1, 64, 64) and out[8].shape == (B, 1, 8, 8)
    assert int(jnp.min(out[64])) >= 0 and int(jnp.max(out[64])) < N_CENTROIDS
    print("KERNEL_OK")
</pallas_src>

<mosaic_0001>
module attributes {stable_mosaic.version = 11 : i64} {
  func.func @_kmeans_label_kernel(%arg0: i32, %arg1: memref<256x48xbf16, #tpu.memory_space<vmem>>, %arg2: memref<48x16xbf16, #tpu.memory_space<vmem>>, %arg3: memref<1x16xf32, #tpu.memory_space<vmem>>, %arg4: memref<1x1x256xi32, #tpu.memory_space<vmem>>) attributes {dimension_semantics = [#tpu.dimension_semantics<parallel>], iteration_bounds = array<i64: 2>, scalar_prefetch = 0 : i64, scratch_operands = 0 : i64, tpu.core_type = #tpu.core_type<tc>, window_params = [{transform_indices = @transform_0, window_bounds = array<i64: 256, 48>}, {pipeline_mode = #tpu.pipeline_mode<synchronous>, transform_indices = @transform_1, window_bounds = array<i64: 48, 16>}, {pipeline_mode = #tpu.pipeline_mode<synchronous>, transform_indices = @transform_2, window_bounds = array<i64: 1, 16>}, {transform_indices = @transform_3, window_bounds = array<i64: 1, 1, 256>}]} {
    %c0 = arith.constant 0 : index
    %c0_0 = arith.constant 0 : index
    %0 = vector.load %arg1[%c0, %c0_0] : memref<256x48xbf16, #tpu.memory_space<vmem>>, vector<256x48xbf16>
    %c0_1 = arith.constant 0 : index
    %c0_2 = arith.constant 0 : index
    %1 = vector.load %arg2[%c0_1, %c0_2] : memref<48x16xbf16, #tpu.memory_space<vmem>>, vector<48x16xbf16>
    %cst = arith.constant dense<0.000000e+00> : vector<256x16xf32>
    %2 = tpu.matmul %0, %1, %cst {dimension_numbers = #tpu.dot_dimension_numbers<[1], [0], [0], [1], [0, 0, 1, 1], [], []>} : vector<256x48xbf16>, vector<48x16xbf16>, vector<256x16xf32> -> vector<256x16xf32>
    %c0_3 = arith.constant 0 : index
    %c0_4 = arith.constant 0 : index
    %3 = vector.load %arg3[%c0_3, %c0_4] : memref<1x16xf32, #tpu.memory_space<vmem>>, vector<1x16xf32>
    %cst_5 = arith.constant 2.000000e+00 : f32
    %4 = vector.broadcast %cst_5 : f32 to vector<256x16xf32>
    %5 = arith.mulf %4, %2 : vector<256x16xf32>
    %6 = vector.broadcast %3 : vector<1x16xf32> to vector<256x16xf32>
    %7 = arith.subf %6, %5 : vector<256x16xf32>
    %cst_6 = arith.constant dense<0x7F800000> : vector<256xf32>
    %8 = vector.multi_reduction <minimumf>, %7, %cst_6 [1] : vector<256x16xf32> to vector<256xf32>
    %9 = vector.shape_cast %8 : vector<256xf32> to vector<256x1xf32>
    %10 = tpu.iota {dimensions = array<i32: 1>} : vector<256x16xi32>
    %11 = vector.broadcast %9 : vector<256x1xf32> to vector<256x16xf32>
    %12 = arith.cmpf oeq, %7, %11 : vector<256x16xf32>
    %c16_i32 = arith.constant 16 : i32
    %13 = vector.broadcast %c16_i32 : i32 to vector<256x16xi32>
    %14 = arith.select %12, %10, %13 : vector<256x16xi1>, vector<256x16xi32>
    %cst_7 = arith.constant dense<2147483647> : vector<256xi32>
    %15 = vector.multi_reduction <minsi>, %14, %cst_7 [1] : vector<256x16xi32> to vector<256xi32>
    %16 = vector.shape_cast %15 : vector<256xi32> to vector<1x1x256xi32>
    %c0_8 = arith.constant 0 : index
    %c0_9 = arith.constant 0 : index
    %c0_10 = arith.constant 0 : index
    %17 = vector.load %arg4[%c0_8, %c0_9, %c0_10] : memref<1x1x256xi32, #tpu.memory_space<vmem>>, vector<1x1x256xi32>
    tpu.vector_store %arg4[%c0_8, %c0_9, %c0_10], %16 {strides = array<i32>} : memref<1x1x256xi32, #tpu.memory_space<vmem>>, vector<1x1x256xi32>,
    return
  }
  func.func @transform_0(%arg0: i32) -> (i32, i32) {
    %c0_i32 = arith.constant 0 : i32
    %c0_i32_0 = arith.constant 0 : i32
    return %arg0, %c0_i32 : i32, i32
  }
  func.func @transform_1(%arg0: i32) -> (i32, i32) {
    %c0_i32 = arith.constant 0 : i32
    %c0_i32_0 = arith.constant 0 : i32
    %c0_i32_1 = arith.constant 0 : i32
    return %c0_i32, %c0_i32_0 : i32, i32
  }
  func.func @transform_2(%arg0: i32) -> (i32, i32) {
    %c0_i32 = arith.constant 0 : i32
    %c0_i32_0 = arith.constant 0 : i32
    %c0_i32_1 = arith.constant 0 : i32
    return %c0_i32, %c0_i32_0 : i32, i32
  }
  func.func @transform_3(%arg0: i32) -> (i32, i32, i32) {
    %c0_i32 = arith.constant 0 : i32
    %c0_i32_0 = arith.constant 0 : i32
    %c0_i32_1 = arith.constant 0 : i32
    return %arg0, %c0_i32, %c0_i32_0 : i32, i32, i32
  }
}

</mosaic_0001>

<bundles_post_ra>
// kernel: tpu_custom_call.1
= control target key start
LH: loop header
LB: loop body
LE: loop exit
PB: predicated region body
PF: predicated region fallthrough
CT: control target
= control target key end

     0   :  { %8 = vsyncpa [#allocation3], 0  ;;  %s3172_s0 = inlined_call_operand.vmem [shape: bf16[512,48], index: 0, kind: input, shape index: {}]   ;;  %s3173_s1 = inlined_call_operand.vmem [shape: bf16[48,16], index: 1, kind: input, shape index: {}]   ;;  %s3174_s2 = inlined_call_operand.vmem [shape: f32[1,16], index: 2, kind: input, shape index: {}]   ;;  %s3175_s3 = inlined_call_operand.hbm [shape: s32[2,1,256], index: 3, kind: output, shape index: {}]  }
   0x1   :  { %10 = vsyncpa [#allocation3 + $0x1], 0  ;;  %s2239_s12 = smov 0   ;;  %s2241_s13 = smov 0  }
   0x2   :  { %s2243_s14 = smov 0   ;;  %s2245_s15 = smov 0  }
   0x3 LB: > { %s2260_s16 = sadd.s32 4294967295, %s2216_s15   ;;  %s1979_s17 = sadd.s32 4294967294, %s2216_s15   ;;  %s2216_s15 = sphi %s2245_s15, %s3211_s15   ;;  %s2212_s14 = sphi %s2243_s14, %s3210_s14   ;;  %s2208_s13 = sphi %s2241_s13, %s3209_s13   ;;  %s2204_s12 = sphi %s2239_s12, %s3208_s12  }
   0x4   : > { %s2264_s18 = sadd.s32 1, %s2216_s15   ;;  %s91_s19 = sadd.s32 1, %s2212_s14 }
   0x5   : > { %s88_s20 = ssub.s32 %s2216_s15, %s2264_s18  ;;  %p101_p0 = scmp.ne.s32.totalorder %s2212_s14, %s2208_s13 }
   0x6   : > { %p89_p1 = scmp.eq.s32.totalorder %s88_s20, 0  ;;  %p102_p2 = scmp.eq.s32.totalorder %s2260_s16, 1 }
   0x7   : > { %p107_p3 = scmp.ne.s32.totalorder %s2208_s13, %s2204_s12  ;;  %p108_p4 = scmp.eq.s32.totalorder %s1979_s17, 1 }
   0x8   : > { %s2275_s21 = scalar_select %p89_p1, %s2212_s14, %s91_s19  }
   0x9   : > { %p2277_p5 = por %p102_p2, %p101_p0  ;;  %p2281_p6 = por %p108_p4, %p107_p3 }
   0xa   : > { %p1982_p7 = scmp.ge.s32.totalorder %s2216_s15, 1  ;;  %p141_p8 = scmp.lt.s32.totalorder %s2216_s15, 3 }
   0xc   : > { %p142_p9 = pnand %p1982_p7, %p141_p8 }
   0xe   : > { %145 = sbr.rel (%p142_p9) target bundleno = 2223 (0x8af), region = 32 }
  0x13   : > { %v2100_v0 = vld [vmem:[%s3173_s1 + $0x10] sm:$0xff]  ;;  %s1984_s26 = sshll.u32 %s2260_s16, 5  ;;  %v2099_v1 = vld [vmem:[%s3173_s1 + $0x8] sm:$0xff]  ;;  %v2098_v2 = vld [vmem:[%s3173_s1] sm:$0xff]  ;;  %vm308_vm0 = vcmask 392192   ;;  %vm514_vm1 = vcmask 130048  }
  0x14   : > { %p166_p10 = scmp.lt.s32.totalorder %s1984_s26, 63  ;;  %362 = vmatpush.bf16.msra.mxu0 %v2100_v0  ;;  %2101 = vmatpush.bf16.msra.mxu1 %v2100_v0  ;;  %v2337_v19 = vld [vmem:[%s3174_s2] ss:$0 sm:$0xff]  ;;  %s162_s10 = sand.u32 1, %s2208_s13  }
  0x15   : > { %2102 = vmatpush.bf16.msra.mxu2 %v2100_v0  ;;  %2103 = vmatpush.bf16.msra.mxu3 %v2100_v0  ;;  %s3131_s11 = sshll.u32 %s162_s10, 1  ;;  %s2079_s17 = sshll.u32 %s2260_s16, 1 }
  0x16   : > { %s3213_s26 = smov (!%p166_p10, %s1984_s26), 63  ;;  %s1915_s24 = scalar_lea.hbm %s3175_s3, %s2079_s17 }
  0x17   : > { %s1985_s29 = sshll.u32 %s3213_s26, 2  ;;  %s164_s16 = scalar_lea.vmem [#allocation2], %s3131_s11 }
  0x18   : > { %363 = vmatpush.bf16.msra.mxu0 %v2099_v1  ;;  %2104 = vmatpush.bf16.msra.mxu1 %v2099_v1  ;;  %s2300_s7 = scalar_lea.vmem %s3172_s0, %s1985_s29  ;;  %s1917_s25 = sshll.u32 %s164_s16, 4  ;;  %s1918_s25 = int_to_ptr.vmem [resolvable:$true] %s1917_s25 }
  0x19   : > { %2105 = vmatpush.bf16.msra.mxu2 %v2099_v1  ;;  %2106 = vmatpush.bf16.msra.mxu3 %v2099_v1  ;;  %v2082_v3 = vld [vmem:[%s2300_s7] sm:$0xff]  ;;  %v2083_v7 = vld [vmem:[%s2300_s7 + $0x8] sm:$0xff]  ;;  %v2084_v11 = vld [vmem:[%s2300_s7 + $0x10] sm:$0xff]  ;;  %s1919_s26 = sshll.u32 %s1915_s24, 4  ;;  %s1905_s27 = scalar_lea.sflag [#allocation3], %s162_s10  ;;  %s1920_s26 = int_to_ptr.hbm [resolvable:$true] %s1919_s26 }
  0x1a   : > { %v2086_v4 = vld [vmem:[%s2300_s7 + $0x20] sm:$0xff]  ;;  %v2087_v8 = vld [vmem:[%s2300_s7 + $0x28] sm:$0xff]  ;;  %v2088_v12 = vld [vmem:[%s2300_s7 + $0x30] sm:$0xff]  ;;  %s2168_s28 = sshra.s32 %s1920_s26, 4  ;;  %s2174_s5 = scalar_lea.hbm %s3175_s3, 4  ;;  %s2169_s28 = int_to_ptr.hbm [resolvable:$true] %s2168_s28 }
  0x1b   : > { %v2090_v5 = vld [vmem:[%s2300_s7 + $0x40] sm:$0xff]  ;;  %v2095_v9 = vld [vmem:[%s2300_s7 + $0x68] sm:$0xff]  ;;  %v2092_v13 = vld [vmem:[%s2300_s7 + $0x50] sm:$0xff]  ;;  %s2170_s29 = scalar_lea.hbm %s2169_s28, 2  ;;  %p2175_p0 = scmp.lt.s32.totalorder %s2169_s28, %s3175_s3 }
  0x1c   : > { %364 = vmatpush.bf16.msra.mxu0 %v2098_v2  ;;  %2107 = vmatpush.bf16.msra.mxu1 %v2098_v2  ;;  %v2094_v6 = vld [vmem:[%s2300_s7 + $0x60] sm:$0xff]  ;;  %v2091_v10 = vld [vmem:[%s2300_s7 + $0x48] sm:$0xff]  ;;  %v2096_v14 = vld [vmem:[%s2300_s7 + $0x70] sm:$0xff]  ;;  %p2171_p11 = scmp.ne.s32.totalorder %s2169_s28, %s2170_s29  ;;  %p2176_p1 = scmp.lt.s32.totalorder %s2174_s5, %s2170_s29 }
  0x1d   : > { %2108 = vmatpush.bf16.msra.mxu2 %v2098_v2  ;;  %2109 = vmatpush.bf16.msra.mxu3 %v2098_v2  ;;  %v2085_v15 = vld [vmem:[%s2300_s7 + $0x18] sm:$0xff] }
  0x1e   : > { %v2089_v16 = vld [vmem:[%s2300_s7 + $0x38] sm:$0xff]  ;;  %p2172_p12 = pnand %p2171_p11, %p2277_p5  ;;  %p2177_p2 = por %p2176_p1, %p2175_p0 }
  0x1f   : > { %2062 = vmatmul.msk.bf16.vlgmr.msra.gmra.mxu0 %vm308_vm0, %v2082_v3  ;;  %2066 = vmatmul.msk.bf16.vlgmr.msra.gmra.mxu1 %vm308_vm0, %v2086_v4  ;;  %v2093_v17 = vld [vmem:[%s2300_s7 + $0x58] sm:$0xff] }
  0x20   : > { %2070 = vmatmul.msk.bf16.vlgmr.msra.gmra.mxu2 %vm308_vm0, %v2090_v5  ;;  %2074 = vmatmul.msk.bf16.vlgmr.msra.gmra.mxu3 %vm308_vm0, %v2094_v6  ;;  %v2097_v18 = vld [vmem:[%s2300_s7 + $0x78] sm:$0xff]  ;;  %p2173_p13 = pneg %p2172_p12 }
  0x22   : > { %p2178_p3 = pnand %p2177_p2, %p2173_p13 }
  0x2f   : > { %2063 = vmatmul.msk.bf16.gmra.mxu0 %vm308_vm0, %v2083_v7  ;;  %2067 = vmatmul.msk.bf16.gmra.mxu1 %vm308_vm0, %v2087_v8 }
  0x30   : > { %2075 = vmatmul.msk.bf16.gmra.mxu3 %vm308_vm0, %v2095_v9  ;;  %2071 = vmatmul.msk.bf16.gmra.mxu2 %vm308_vm0, %v2091_v10 }
  0x3f   : > { %2064 = vmatmul.msk.bf16.gmra.mxu0 %vm308_vm0, %v2084_v11  ;;  %2068 = vmatmul.msk.bf16.gmra.mxu1 %vm308_vm0, %v2088_v12 }
  0x40   : > { %2072 = vmatmul.msk.bf16.gmra.mxu2 %vm308_vm0, %v2092_v13  ;;  %2076 = vmatmul.msk.bf16.gmra.mxu3 %vm308_vm0, %v2096_v14 }
  0x4f   : > { %2065 = vmatmul.msk.bf16.gmra.mxu0 %vm308_vm0, %v2085_v15  ;;  %2069 = vmatmul.msk.bf16.gmra.mxu1 %vm308_vm0, %v2089_v16 }
  0x50   : > { %2073 = vmatmul.msk.bf16.gmra.mxu2 %vm308_vm0, %v2093_v17  ;;  %2077 = vmatmul.msk.bf16.gmra.mxu3 %vm308_vm0, %v2097_v18 }
  0x9c   : > { %v366_v20 = vpop.f32.mrf.mxu0  ;;  %v386_v21 = vpop.f32.mrf.mxu1 }
  0x9d   : > { %v447_v22 = vmul.f32 2.0, %v366_v20  ;;  %v455_v23 = vmul.f32 2.0, %v386_v21 }
  0x9f   : > { %v2340_v24 = vsub.f32 %v2337_v19, %v455_v23  ;;  %v2343_v25 = vsub.f32 %v2337_v19, %v447_v22 }
  0xa1   : > { %v539_v26 = vsel %vm514_vm1, %v2340_v24, inf  ;;  %v515_v27 = vsel %vm514_vm1, %v2343_v25, inf }
  0xa2   : > { %540 = vmin.xlane.f32.xlu2 %v539_v26  ;;  %516 = vmin.xlane.f32.xlu0 %v515_v27 }
  0xa3   : > { %v406_v28 = vpop.f32.mrf.mxu2  ;;  %v426_v29 = vpop.f32.mrf.mxu3 }
  0xa4   : > { %v463_v30 = vmul.f32 2.0, %v406_v28  ;;  %v471_v31 = vmul.f32 2.0, %v426_v29  ;;  %v368_v32 = vpop.f32.mrf.mxu0  ;;  %v388_v33 = vpop.f32.mrf.mxu1 }
  0xa5   : > { %v448_v38 = vmul.f32 2.0, %v368_v32  ;;  %v456_v49 = vmul.f32 2.0, %v388_v33 }
  0xa6   : > { %v2350_v34 = vsub.f32 %v2337_v19, %v463_v30  ;;  %v2353_v35 = vsub.f32 %v2337_v19, %v471_v31 }
  0xa7   : > { %v2360_v45 = vsub.f32 %v2337_v19, %v448_v38  ;;  %v2378_v56 = vsub.f32 %v2337_v19, %v456_v49 }
  0xa8   : > { %v563_v36 = vsel %vm514_vm1, %v2350_v34, inf  ;;  %v587_v37 = vsel %vm514_vm1, %v2353_v35, inf }
  0xa9   : > { %564 = vmin.xlane.f32.xlu1 %v563_v36  ;;  %v518_v52 = vsel %vm514_vm1, %v2360_v45, inf  ;;  %v542_v1 = vsel %vm514_vm1, %v2378_v56, inf }
  0xaa   : > { %588 = vmin.xlane.f32.xlu0 %v587_v37 }
  0xab   : > { %v408_v39 = vpop.f32.mrf.mxu2  ;;  %v428_v40 = vpop.f32.mrf.mxu3 }
  0xac   : > { %v464_v41 = vmul.f32 2.0, %v408_v39  ;;  %v472_v42 = vmul.f32 2.0, %v428_v40  ;;  %v391_v43 = vpop.f32.mrf.mxu1  ;;  %v371_v44 = vpop.f32.mrf.mxu0 }
  0xad   : > { %v449_v48 = vmul.f32 2.0, %v371_v44  ;;  %v457_v60 = vmul.f32 2.0, %v391_v43 }
  0xae   : > { %v2363_v46 = vsub.f32 %v2337_v19, %v472_v42  ;;  %v2366_v47 = vsub.f32 %v2337_v19, %v464_v41 }
  0xaf   : > { %v2375_v53 = vsub.f32 %v2337_v19, %v449_v48  ;;  %v2393_v4 = vsub.f32 %v2337_v19, %v457_v60 }
  0xb0   : > { %v590_v50 = vsel %vm514_vm1, %v2363_v46, inf  ;;  %v566_v51 = vsel %vm514_vm1, %v2366_v47, inf }
  0xb1   : > { %591 = vmin.xlane.f32.xlu1 %v590_v50  ;;  %567 = vmin.xlane.f32.xlu2 %v566_v51  ;;  %v521_v62 = vsel %vm514_vm1, %v2375_v53, inf  ;;  %v545_v11 = vsel %vm514_vm1, %v2393_v4, inf }
  0xb2   : > { %519 = vmin.xlane.f32.xlu0 %v518_v52 }
  0xb3   : > { %v431_v54 = vpop.f32.mrf.mxu3  ;;  %v411_v55 = vpop.f32.mrf.mxu2 }
  0xb4   : > { %v473_v57 = vmul.f32 2.0, %v431_v54  ;;  %v393_v58 = vpop.f32.mrf.mxu1  ;;  %v373_v59 = vpop.f32.mrf.mxu0  ;;  %v465_v0 = vmul.f32 2.0, %v411_v55 }
  0xb5   : > { %v458_v63 = vmul.f32 2.0, %v393_v58  ;;  %v450_v9 = vmul.f32 2.0, %v373_v59 }
  0xb6   : > { %v2381_v61 = vsub.f32 %v2337_v19, %v473_v57  ;;  %v2396_v6 = vsub.f32 %v2337_v19, %v465_v0 }
  0xb7   : > { %v2390_v3 = vsub.f32 %v2337_v19, %v458_v63  ;;  %v2405_v15 = vsub.f32 %v2337_v19, %v450_v9 }
  0xb8   : > { %3185 = vst [vmem:[#allocation5_spill] sm:$0xff] %v2381_v61  ;;  %v593_v2 = vsel %vm514_vm1, %v2381_v61, inf  ;;  %v569_v13 = vsel %vm514_vm1, %v2396_v6, inf }
  0xb9   : > { %594 = vmin.xlane.f32.xlu2 %v593_v2  ;;  %522 = vmin.xlane.f32.xlu1 %v521_v62  ;;  %v548_v10 = vsel %vm514_vm1, %v2390_v3, inf  ;;  %v524_v22 = vsel %vm514_vm1, %v2405_v15, inf }
  0xba   : > { %543 = vmin.xlane.f32.xlu0 %v542_v1 }
  0xbb   : > { %v413_v5 = vpop.f32.mrf.mxu2  ;;  %v433_v8 = vpop.f32.mrf.mxu3 }
  0xbc   : > { %v376_v7 = vpop.f32.mrf.mxu0  ;;  %v474_v14 = vmul.f32 2.0, %v433_v8  ;;  %v396_v20 = vpop.f32.mrf.mxu1  ;;  %v466_v21 = vmul.f32 2.0, %v413_v5 }
  0xbd   : > { %v451_v12 = vmul.f32 2.0, %v376_v7  ;;  %v459_v28 = vmul.f32 2.0, %v396_v20 }
  0xbe   : > { %v2411_v18 = vsub.f32 %v2337_v19, %v474_v14  ;;  %v2420_v30 = vsub.f32 %v2337_v19, %v466_v21 }
  0xbf   : > { %v2408_v16 = vsub.f32 %v2337_v19, %v451_v12  ;;  %v2426_v32 = vsub.f32 %v2337_v19, %v459_v28 }
  0xc0   : > { %3186 = vst [vmem:[#allocation6_spill] sm:$0xff] %v2411_v18  ;;  %v596_v27 = vsel %vm514_vm1, %v2411_v18, inf  ;;  %v572_v37 = vsel %vm514_vm1, %v2420_v30, inf }
  0xc1   : > { %549 = vmin.xlane.f32.xlu2 %v548_v10  ;;  %546 = vmin.xlane.f32.xlu1 %v545_v11  ;;  %v527_v23 = vsel %vm514_vm1, %v2408_v16, inf  ;;  %v551_v41 = vsel %vm514_vm1, %v2426_v32, inf }
  0xc2   : > { %570 = vmin.xlane.f32.xlu0 %v569_v13 }
  0xc3   : > { %v416_v17 = vpop.f32.mrf.mxu2  ;;  %v436_v29 = vpop.f32.mrf.mxu3 }
  0xc4   : > { %v467_v26 = vmul.f32 2.0, %v416_v17  ;;  %v378_v33 = vpop.f32.mrf.mxu0  ;;  %v475_v39 = vmul.f32 2.0, %v436_v29  ;;  %v398_v43 = vpop.f32.mrf.mxu1 }
  0xc5   : > { %v452_v40 = vmul.f32 2.0, %v378_v33  ;;  %v460_v55 = vmul.f32 2.0, %v398_v43 }
  0xc6   : > { %v2423_v31 = vsub.f32 %v2337_v19, %v467_v26  ;;  %v2435_v44 = vsub.f32 %v2337_v19, %v475_v39 }
  0xc7   : > { %v2438_v48 = vsub.f32 %v2337_v19, %v452_v40  ;;  %v2450_v62 = vsub.f32 %v2337_v19, %v460_v55 }
  0xc8   : > { %v575_v38 = vsel %vm514_vm1, %v2423_v31, inf  ;;  %3187 = vst [vmem:[#allocation7_spill] sm:$0xff] %v2435_v44  ;;  %v599_v52 = vsel %vm514_vm1, %v2435_v44, inf }
  0xc9   : > { %525 = vmin.xlane.f32.xlu1 %v524_v22  ;;  %528 = vmin.xlane.f32.xlu2 %v527_v23  ;;  %v530_v54 = vsel %vm514_vm1, %v2438_v48, inf  ;;  %v554_v5 = vsel %vm514_vm1, %v2450_v62, inf }
  0xca   : > { %597 = vmin.xlane.f32.xlu0 %v596_v27 }
  0xcb   : > { %v418_v36 = vpop.f32.mrf.mxu2  ;;  %v438_v49 = vpop.f32.mrf.mxu3 }
  0xcc   : > { %v468_v42 = vmul.f32 2.0, %v418_v36  ;;  %v381_v51 = vpop.f32.mrf.mxu0  ;;  %v476_v57 = vmul.f32 2.0, %v438_v49  ;;  %v401_v0 = vpop.f32.mrf.mxu1 }
  0xcd   : > { %v453_v59 = vmul.f32 2.0, %v381_v51  ;;  %v461_v8 = vmul.f32 2.0, %v401_v0  ;;  %v3176_v51 = vlaneseq }
  0xce   : > { %v2441_v50 = vsub.f32 %v2337_v19, %v468_v42  ;;  %v2453_v63 = vsub.f32 %v2337_v19, %v476_v57 }
  0xcf   : > { %v2456_v1 = vsub.f32 %v2337_v19, %v453_v59  ;;  %v2468_v13 = vsub.f32 %v2337_v19, %v461_v8 }
  0xd0   : > { %v578_v58 = vsel %vm514_vm1, %v2441_v50, inf  ;;  %3188 = vst [vmem:[#allocation8_spill] sm:$0xff] %v2453_v63  ;;  %v602_v7 = vsel %vm514_vm1, %v2453_v63, inf }
  0xd1   : > { %573 = vmin.xlane.f32.xlu1 %v572_v37  ;;  %576 = vmin.xlane.f32.xlu2 %v575_v38  ;;  %v533_v10 = vsel %vm514_vm1, %v2456_v1, inf  ;;  %v557_v23 = vsel %vm514_vm1, %v2468_v13, inf }
  0xd2   : > { %552 = vmin.xlane.f32.xlu0 %v551_v41 }
  0xd3   : > { %v421_v60 = vpop.f32.mrf.mxu2  ;;  %v441_v2 = vpop.f32.mrf.mxu3 }
  0xd4   : > { %v469_v9 = vmul.f32 2.0, %v421_v60  ;;  %v477_v11 = vmul.f32 2.0, %v441_v2  ;;  %v383_v20 = vpop.f32.mrf.mxu0  ;;  %v403_v21 = vpop.f32.mrf.mxu1 }
  0xd5   : > { %v454_v27 = vmul.f32 2.0, %v383_v20  ;;  %v462_v29 = vmul.f32 2.0, %v403_v21 }
  0xd6   : > { %v2465_v12 = vsub.f32 %v2337_v19, %v469_v9  ;;  %v2471_v17 = vsub.f32 %v2337_v19, %v477_v11 }
  0xd7   : > { %v2483_v36 = vsub.f32 %v2337_v19, %v454_v27  ;;  %v2486_v37 = vsub.f32 %v2337_v19, %v462_v29 }
  0xd8   : > { %3189 = vst [vmem:[#allocation9_spill] sm:$0xff] %v2471_v17  ;;  %v581_v22 = vsel %vm514_vm1, %v2465_v12, inf  ;;  %v605_v28 = vsel %vm514_vm1, %v2471_v17, inf }
  0xd9   : > { %600 = vmin.xlane.f32.xlu1 %v599_v52  ;;  %531 = vmin.xlane.f32.xlu2 %v530_v54  ;;  %v536_v40 = vsel %vm514_vm1, %v2483_v36, inf  ;;  %v560_v42 = vsel %vm514_vm1, %v2486_v37, inf  ;;  %v2500_v52 = vand.u32 127, %v3176_v51 }
  0xda   : > { %579 = vmin.xlane.f32.xlu0 %v578_v58 }
  0xdb   : > { %v423_v14 = vpop.f32.mrf.mxu2  ;;  %v443_v38 = vpop.f32.mrf.mxu3 }
  0xdc   : > { %v470_v26 = vmul.f32 2.0, %v423_v14  ;;  %v478_v41 = vmul.f32 2.0, %v443_v38 }
  0xde   : > { %v2480_v33 = vsub.f32 %v2337_v19, %v470_v26  ;;  %v2495_v43 = vsub.f32 %v2337_v19, %v478_v41 }
  0xe0   : > { %v584_v39 = vsel %vm514_vm1, %v2480_v33, inf  ;;  %3190 = vst [vmem:[#allocation10_spill] sm:$0xff] %v2495_v43  ;;  %v608_v49 = vsel %vm514_vm1, %v2495_v43, inf }
  0xe1   : > { %555 = vmin.xlane.f32.xlu1 %v554_v5  ;;  %603 = vmin.xlane.f32.xlu2 %v602_v7 }
  0xe2   : > { %534 = vmin.xlane.f32.xlu0 %v533_v10 }
  0xe9   : > { %582 = vmin.xlane.f32.xlu1 %v581_v22  ;;  %558 = vmin.xlane.f32.xlu2 %v557_v23 }
  0xea   : > { %606 = vmin.xlane.f32.xlu0 %v605_v28 }
  0xf1   : > { %585 = vmin.xlane.f32.xlu2 %v584_v39  ;;  %537 = vmin.xlane.f32.xlu1 %v536_v40 }
  0xf2   : > { %561 = vmin.xlane.f32.xlu0 %v560_v42 }
  0xf9   : > { %609 = vmin.xlane.f32.xlu1 %v608_v49 }
 0x115   : > { %v517_v54 = vpop.xlane.xlu0 %516  ;;  %v2510_v59 = vpop.xlane.xlu2 %540 }
 0x116   : > { %vm613_vm2 = vcmp.eq.f32.partialorder %v2343_v25, %v517_v54  ;;  %vm621_vm10 = vcmp.eq.f32.partialorder %v2340_v24, %v2510_v59 }
 0x117   : > { %v645_v55 = vsel %vm613_vm2, %v2500_v52, 16 }
 0x118   : > { %v2505_v57 = vsel %vm514_vm1, %v645_v55, 2147483647 }
 0x119   : > { %v679_v58 = vshra.s32 %v2505_v57, 16 }
 0x11b   : > { %v2508_v19 = vcvt.s32.f32 %v679_v58 }
 0x11c   : > { %v2512_v60 = vpop.xlane.xlu1 %564 }
 0x11d   : > { %v2514_v0 = vpop.xlane.xlu0 %588  ;;  %682 = vmin.xlane.f32.xlu2 %v2508_v19 }
 0x124   : > { %v2517_v2 = vpop.xlane.xlu1 %591  ;;  %v2519_v25 = vpop.xlane.xlu2 %567 }
 0x125   : > { %v520_v5 = vpop.xlane.xlu0 %519 }
 0x126   : > { %vm614_vm3 = vcmp.eq.f32.partialorder %v2360_v45, %v520_v5 }
 0x127   : > { %v646_v7 = vsel %vm614_vm3, %v2500_v52, 16 }
 0x128   : > { %v2524_v8 = vsel %vm514_vm1, %v646_v7, 2147483647 }
 0x129   : > { %v694_v9 = vshra.s32 %v2524_v8, 16 }
 0x12b   : > { %v2527_v10 = vcvt.s32.f32 %v694_v9 }
 0x12c   : > { %v2529_v11 = vpop.xlane.xlu2 %594  ;;  %v523_v14 = vpop.xlane.xlu1 %522 }
 0x12d   : > { %3191 = vst [vmem:[#allocation11_spill] sm:$0xff] %v2529_v11  ;;  %vm615_vm4 = vcmp.eq.f32.partialorder %v2375_v53, %v523_v14  ;;  %697 = vmin.xlane.f32.xlu1 %v2527_v10  ;;  %v544_v55 = vpop.xlane.xlu0 %543 }
 0x12e   : > { %v647_v20 = vsel %vm615_vm4, %v2500_v52, 16  ;;  %vm622_vm13 = vcmp.eq.f32.partialorder %v2378_v56, %v544_v55 }
 0x12f   : > { %v2535_v45 = vsel %vm514_vm1, %v647_v20, 2147483647 }
 0x130   : > { %v709_v21 = vshra.s32 %v2535_v45, 16 }
 0x132   : > { %v2538_v22 = vcvt.s32.f32 %v709_v21 }
 0x134   : > { %v2540_v23 = vpop.xlane.xlu2 %549  ;;  %v2542_v26 = vpop.xlane.xlu1 %546  ;;  %712 = vmin.xlane.f32.xlu0 %v2538_v22 }
 0x135   : > { %v2573_v7 = vpop.xlane.xlu0 %570  ;;  %vm623_vm4 = vcmp.eq.f32.partialorder %v2393_v4, %v2542_v26 }
 0x13c   : > { %v526_v27 = vpop.xlane.xlu1 %525  ;;  %v529_v28 = vpop.xlane.xlu2 %528 }
 0x13d   : > { %vm616_vm5 = vcmp.eq.f32.partialorder %v2405_v15, %v526_v27  ;;  %vm617_vm6 = vcmp.eq.f32.partialorder %v2408_v16, %v529_v28 }
 0x13e   : > { %v648_v53 = vsel %vm616_vm5, %v2500_v52, 16  ;;  %v649_v29 = vsel %vm617_vm6, %v2500_v52, 16 }
 0x13f   : > { %v2550_v38 = vsel %vm514_vm1, %v648_v53, 2147483647  ;;  %v2553_v39 = vsel %vm514_vm1, %v649_v29, 2147483647  ;;  %v2584_v53 = vpop.xlane.xlu0 %597 }
 0x140   : > { %v724_v40 = vshra.s32 %v2550_v38, 16  ;;  %v739_v41 = vshra.s32 %v2553_v39, 16  ;;  %v723_v55 = vand.u32 65535, %v2550_v38 }
 0x142   : > { %v2557_v42 = vcvt.s32.f32 %v724_v40  ;;  %v2559_v49 = vcvt.s32.f32 %v739_v41 }
 0x144   : > { %v2561_v15 = vpop.xlane.xlu1 %573  ;;  %727 = vmin.xlane.f32.xlu2 %v2557_v42  ;;  %742 = vmin.xlane.f32.xlu1 %v2559_v49  ;;  %v2571_v5 = vpop.xlane.xlu2 %576 }
 0x147   : > { %v2588_v40 = vpop.xlane.xlu0 %552 }
 0x14c   : > { %v2565_v16 = vpop.xlane.xlu1 %600  ;;  %v532_v27 = vpop.xlane.xlu2 %531 }
 0x14d   : > { %3192 = vst [vmem:[#allocation12_spill] sm:$0xff] %v2565_v16  ;;  %vm618_vm8 = vcmp.eq.f32.partialorder %v2438_v48, %v532_v27 }
 0x14e   : > { %v650_v51 = vsel %vm618_vm8, %v2500_v52, 16 }
 0x14f   : > { %v2601_v44 = vsel %vm514_vm1, %v650_v51, 2147483647 }
 0x150   : > { %v754_v48 = vshra.s32 %v2601_v44, 16 }
 0x154   : > { %v2567_v54 = vpop.xlane.xlu1 %555  ;;  %v2586_v29 = vpop.xlane.xlu2 %603 }
 0x155   : > { %3193 = vst [vmem:[#allocation13_spill] sm:$0xff] %v2586_v29  ;;  %v2611_v29 = vcvt.s32.f32 %v754_v48 }
 0x15c   : > { %v2569_v58 = vpop.xlane.xlu1 %582  ;;  %v2590_v41 = vpop.xlane.xlu2 %558 }
 0x164   : > { %v538_v9 = vpop.xlane.xlu1 %537 }
 0x165   : > { %vm620_vm7 = vcmp.eq.f32.partialorder %v2483_v36, %v538_v9  ;;  %v2592_v36 = vpop.xlane.xlu0 %579  ;;  %v2594_v9 = vpop.xlane.xlu2 %585 }
 0x166   : > { %v652_v14 = vsel %vm620_vm7, %v2500_v52, 16  ;;  %vm624_vm7 = vcmp.eq.f32.partialorder %v2390_v3, %v2540_v23 }
 0x167   : > { %v2578_v20 = vsel %vm514_vm1, %v652_v14, 2147483647 }
 0x168   : > { %v784_v21 = vshra.s32 %v2578_v20, 16  ;;  %v783_v38 = vand.u32 65535, %v2578_v20 }
 0x16a   : > { %v2581_v28 = vcvt.s32.f32 %v784_v21  ;;  %v678_v21 = vand.u32 65535, %v2505_v57  ;;  %v653_v57 = vsel %vm621_vm10, %v2500_v52, 16  ;;  %vm625_vm10 = vcmp.eq.f32.partialorder %v2426_v32, %v2588_v40 }
 0x16c   : > { %787 = vmin.xlane.f32.xlu1 %v2581_v28  ;;  %v680_v43 = vcvt.s32.f32 %v678_v21  ;;  %v2609_v27 = vpop.xlane.xlu1 %609 }
 0x16d   : > { %v535_v14 = vpop.xlane.xlu0 %534  ;;  %3195 = vst [vmem:[#allocation15_spill] sm:$0xff] %v2609_v27 }
 0x16e   : > { %vm619_vm11 = vcmp.eq.f32.partialorder %v2456_v1, %v535_v14 }
 0x16f   : > { %v651_v51 = vsel %vm619_vm11, %v2500_v52, 16  ;;  %vm626_vm11 = vcmp.eq.f32.partialorder %v2450_v62, %v2567_v54 }
 0x175   : > { %v2605_v63 = vpop.xlane.xlu0 %606 }
 0x176   : > { %3194 = vst [vmem:[#allocation14_spill] sm:$0xff] %v2605_v63 }
 0x17d   : > { %v2621_v59 = vpop.xlane.xlu0 %561 }
 0x190   : > { %v683_v17 = vpop.xlane.xlu2 %682 }
 0x191   : > { %vm684_vm9 = vcmp.eq.f32.partialorder %v2508_v19, %v683_v17  ;;  %v2614_v19 = vsel %vm514_vm1, %v653_v57, 2147483647  ;;  %v2630_v57 = vsel %vm514_vm1, %v651_v51, 2147483647  ;;  %v689_v27 = vcvt.f32.s32 %v683_v17 }
 0x192   : > { %v685_v16 = vsel %vm684_vm9, %v680_v43, inf  ;;  %v693_v43 = vand.u32 65535, %v2524_v8  ;;  %v799_v24 = vshra.s32 %v2614_v19, 16  ;;  %v708_v8 = vand.u32 65535, %v2535_v45 }
 0x193   : > { %686 = vmin.xlane.f32.xlu0 %v685_v16  ;;  %v769_v14 = vshra.s32 %v2630_v57, 16  ;;  %v798_v17 = vand.u32 65535, %v2614_v19  ;;  %v753_v19 = vand.u32 65535, %v2601_v44 }
 0x194   : > { %v695_v21 = vcvt.s32.f32 %v693_v43  ;;  %v2625_v48 = vcvt.s32.f32 %v799_v24  ;;  %v654_v43 = vsel %vm622_vm13, %v2500_v52, 16  ;;  %v710_v63 = vcvt.s32.f32 %v708_v8 }
 0x195   : > { %v2641_v51 = vcvt.s32.f32 %v769_v14  ;;  %v725_v8 = vcvt.s32.f32 %v723_v55  ;;  %v755_v4 = vcvt.s32.f32 %v753_v19  ;;  %vm627_vm13 = vcmp.eq.f32.partialorder %v2468_v13, %v2590_v41 }
 0x19b   : > { %757 = vmin.xlane.f32.xlu0 %v2611_v29 }
 0x1a0   : > { %v2623_v16 = vpop.xlane.xlu1 %697 }
 0x1a1   : > { %vm699_vm12 = vcmp.eq.f32.partialorder %v2527_v10, %v2623_v16 }
 0x1a2   : > { %v700_v1 = vsel %vm699_vm12, %v695_v21, inf  ;;  %v2644_v21 = vsel %vm514_vm1, %v654_v43, 2147483647 }
 0x1a3   : > { %802 = vmin.xlane.f32.xlu0 %v2625_v48  ;;  %701 = vmin.xlane.f32.xlu2 %v700_v1  ;;  %v814_v56 = vshra.s32 %v2644_v21, 16  ;;  %v738_v1 = vand.u32 65535, %v2553_v39  ;;  %v785_v39 = vcvt.s32.f32 %v783_v38 }
 0x1a5   : > { %v2648_v45 = vcvt.s32.f32 %v814_v56  ;;  %v740_v14 = vcvt.s32.f32 %v738_v1  ;;  %v690_v1 = vshll.u32 %v689_v27, 16 }
 0x1a7   : > { %v2637_v24 = vpop.xlane.xlu0 %712 }
 0x1a8   : > { %vm714_vm14 = vcmp.eq.f32.partialorder %v2538_v22, %v2637_v24 }
 0x1a9   : > { %v715_v10 = vsel %vm714_vm14, %v710_v63, inf }
 0x1aa   : > { %716 = vmin.xlane.f32.xlu1 %v715_v10 }
 0x1ab   : > { %772 = vmin.xlane.f32.xlu2 %v2641_v51 }
 0x1b3   : > { %817 = vmin.xlane.f32.xlu2 %v2648_v45 }
 0x1b7   : > { %v2653_v22 = vpop.xlane.xlu2 %727  ;;  %v2655_v63 = vpop.xlane.xlu1 %742 }
 0x1b8   : > { %vm729_vm15 = vcmp.eq.f32.partialorder %v2557_v42, %v2653_v22  ;;  %vm744_vm0 = vcmp.eq.f32.partialorder %v2559_v49, %v2655_v63 }
 0x1b9   : > { %v730_v43 = vsel %vm729_vm15, %v725_v8, inf  ;;  %v745_v10 = vsel %vm744_vm0, %v740_v14, inf  ;;  %vm628_vm15 = vcmp.eq.f32.partialorder %v2486_v37, %v2621_v59  ;;  %vm630_vm0 = vcmp.eq.f32.partialorder %v2366_v47, %v2519_v25 }
 0x1ba   : > { %731 = vmin.xlane.f32.xlu0 %v730_v43 }
 0x1bb   : > { %746 = vmin.xlane.f32.xlu2 %v745_v10 }
 0x1df   : > { %v2662_v56 = vpop.xlane.xlu1 %787 }
 0x1e0   : > { %vm789_vm2 = vcmp.eq.f32.partialorder %v2581_v28, %v2662_v56 }
 0x1e1   : > { %v2666_v55 = vsel %vm789_vm2, %v785_v39, inf }
 0x206   : > { %v687_v42 = vpop.xlane.xlu0 %686 }
 0x207   : > { %v688_v61 = vcvt.f32.s32 %v687_v42  ;;  %v800_v42 = vcvt.s32.f32 %v798_v17 }
 0x209   : > { %v691_v11 = vadd.s32 %v690_v1, %v688_v61  ;;  %v704_v61 = vcvt.f32.s32 %v2623_v16 }
 0x20b   : > { %v1157_v49 = vperm.slane %v691_v11, 0  ;;  %v1158_v8 = vperm.slane %v691_v11, 1  ;;  %v1159_v43 = vperm.slane %v691_v11, 2  ;;  %v1160_v14 = vperm.slane %v691_v11, 3 }
 0x20c   : > { %v1161_v10 = vperm.slane %v691_v11, 4  ;;  %v1162_v20 = vperm.slane %v691_v11, 5  ;;  %v1163_v38 = vperm.slane %v691_v11, 6  ;;  %v1164_v28 = vperm.slane %v691_v11, 7 }
 0x20d   : > { %1413 = vst [vmem:[#allocation1] ss:$9 sm:$0xff] %v1157_v49  ;;  %v705_v1 = vshll.u32 %v704_v61, 16 }
 0x20e   : > { %1415 = vst [vmem:[#allocation1 + $0x1] ss:$9 sm:$0xff] %v1158_v8  ;;  %v2668_v18 = vpop.xlane.xlu0 %757 }
 0x20f   : > { %1417 = vst [vmem:[#allocation1 + $0x2] ss:$9 sm:$0xff] %v1159_v43  ;;  %vm759_vm5 = vcmp.eq.f32.partialorder %v2611_v29, %v2668_v18 }
 0x210   : > { %1419 = vst [vmem:[#allocation1 + $0x3] ss:$9 sm:$0xff] %v1160_v14 }
 0x211   : > { %1421 = vst [vmem:[#allocation1 + $0x4] ss:$9 sm:$0xff] %v1161_v10 }
 0x212   : > { %1423 = vst [vmem:[#allocation1 + $0x5] ss:$9 sm:$0xff] %v1162_v20 }
 0x213   : > { %1425 = vst [vmem:[#allocation1 + $0x6] ss:$9 sm:$0xff] %v1163_v38  ;;  %v655_v38 = vsel %vm623_vm4, %v2500_v52, 16 }
 0x214   : > { %1427 = vst [vmem:[#allocation1 + $0x7] ss:$9 sm:$0xff] %v1164_v28  ;;  %v2687_v61 = vsel %vm514_vm1, %v655_v38, 2147483647 }
 0x216   : > { %v2672_v27 = vpop.xlane.xlu0 %802  ;;  %v702_v39 = vpop.xlane.xlu2 %701 }
 0x217   : > { %v703_v49 = vcvt.f32.s32 %v702_v39  ;;  %vm804_vm3 = vcmp.eq.f32.partialorder %v2625_v48, %v2672_v27  ;;  %v719_v39 = vcvt.f32.s32 %v2637_v24 }
 0x218   : > { %v805_v8 = vsel %vm804_vm3, %v800_v42, inf  ;;  %vm629_vm3 = vcmp.eq.f32.partialorder %v2350_v34, %v2512_v60 }
 0x219   : > { %v706_v11 = vadd.s32 %v705_v1, %v703_v49  ;;  %806 = vmin.xlane.f32.xlu1 %v805_v8  ;;  %v760_v1 = vsel %vm759_vm5, %v755_v4, inf  ;;  %v813_v49 = vand.u32 65535, %v2644_v21  ;;  %v829_v8 = vshra.s32 %v2687_v61, 16 }
 0x21a   : > { %v720_v19 = vshll.u32 %v719_v39, 16  ;;  %v656_v4 = vsel %vm624_vm7, %v2500_v52, 16  ;;  %vm632_vm5 = vcmp.eq.f32.partialorder %v2420_v30, %v2561_v15  ;;  %vm631_vm7 = vcmp.eq.f32.partialorder %v2396_v6, %v2573_v7 }
 0x21b   : > { %v1165_v16 = vperm.slane %v706_v11, 0  ;;  %v1166_v43 = vperm.slane %v706_v11, 1  ;;  %v1167_v14 = vperm.slane %v706_v11, 2  ;;  %v2679_v10 = vld [vmem:[#allocation1] sm:$0xff]  ;;  %v1168_v20 = vperm.slane %v706_v11, 3 }
 0x21c   : > { %v1169_v28 = vperm.slane %v706_v11, 4  ;;  %v1170_v48 = vperm.slane %v706_v11, 5  ;;  %v1171_v26 = vperm.slane %v706_v11, 6  ;;  %v1172_v42 = vperm.slane %v706_v11, 7 }
 0x21d   : > { %1429 = vst [vmem:[#allocation1] ss:$9 sm:$0xff] %v1165_v16  ;;  %v717_v44 = vpop.xlane.xlu1 %716  ;;  %v2694_v38 = vcvt.s32.f32 %v829_v8  ;;  %v768_v11 = vand.u32 65535, %v2630_v57 }
 0x21e   : > { %1430 = vst [vmem:[#allocation1 + $0x1] ss:$9 sm:$0xff] %v1166_v43  ;;  %v2684_v17 = vpop.xlane.xlu2 %772  ;;  %v718_v29 = vcvt.f32.s32 %v717_v44 }
 0x21f   : > { %1431 = vst [vmem:[#allocation1 + $0x2] ss:$9 sm:$0xff] %v1167_v14  ;;  %v815_v14 = vcvt.s32.f32 %v813_v49  ;;  %vm774_vm8 = vcmp.eq.f32.partialorder %v2641_v51, %v2684_v17  ;;  %v770_v3 = vcvt.s32.f32 %v768_v11 }
 0x220   : > { %1432 = vst [vmem:[#allocation1 + $0x3] ss:$9 sm:$0xff] %v1168_v20  ;;  %v721_v16 = vadd.s32 %v720_v19, %v718_v29 }
 0x221   : > { %1433 = vst [vmem:[#allocation1 + $0x4] ss:$9 sm:$0xff] %v1169_v28  ;;  %761 = vmin.xlane.f32.xlu1 %v760_v1  ;;  %v775_v29 = vsel %vm774_vm8, %v770_v3, inf }
 0x222   : > { %1434 = vst [vmem:[#allocation1 + $0x5] ss:$9 sm:$0xff] %v1170_v48  ;;  %v1173_v21 = vperm.slane %v721_v16, 0  ;;  %v1174_v28 = vperm.slane %v721_v16, 1  ;;  %v1175_v48 = vperm.slane %v721_v16, 2  ;;  %v1177_v39 = vperm.slane %v721_v16, 4 }
 0x223   : > { %1435 = vst [vmem:[#allocation1 + $0x6] ss:$9 sm:$0xff] %v1171_v26  ;;  %v734_v26 = vcvt.f32.s32 %v2653_v22  ;;  %v1178_v23 = vperm.slane %v721_v16, 5  ;;  %v1179_v1 = vperm.slane %v721_v16, 6  ;;  %v1180_v22 = vperm.slane %v721_v16, 7 }
 0x224   : > { %1436 = vst [vmem:[#allocation1 + $0x7] ss:$9 sm:$0xff] %v1172_v42  ;;  %v2709_v42 = vsel %vm514_vm1, %v656_v4, 2147483647 }
 0x225   : > { %v735_v49 = vshll.u32 %v734_v26, 16  ;;  %v844_v51 = vshra.s32 %v2709_v42, 16  ;;  %v843_v32 = vand.u32 65535, %v2709_v42 }
 0x226   : > { %v2692_v43 = vpop.xlane.xlu2 %817 }
 0x227   : > { %vm819_vm6 = vcmp.eq.f32.partialorder %v2648_v45, %v2692_v43  ;;  %v1176_v45 = vperm.slane %v721_v16, 3 }
 0x228   : > { %v820_v24 = vsel %vm819_vm6, %v815_v14, inf  ;;  %v2712_v14 = vcvt.s32.f32 %v844_v51 }
 0x229   : > { %832 = vmin.xlane.f32.xlu1 %v2694_v38  ;;  %821 = vmin.xlane.f32.xlu0 %v820_v24 }
 0x22b   : > { %v2702_v20 = vld [vmem:[#allocation1] sm:$0xff] }
 0x22c   : > { %1438 = vst [vmem:[#allocation1] ss:$9 sm:$0xff] %v1173_v21 }
 0x22d   : > { %1439 = vst [vmem:[#allocation1 + $0x1] ss:$9 sm:$0xff] %v1174_v28  ;;  %v732_v44 = vpop.xlane.xlu0 %731 }
 0x22e   : > { %1440 = vst [vmem:[#allocation1 + $0x2] ss:$9 sm:$0xff] %v1175_v48  ;;  %v733_v57 = vcvt.f32.s32 %v732_v44  ;;  %v747_v26 = vpop.xlane.xlu2 %746 }
 0x22f   : > { %1441 = vst [vmem:[#allocation1 + $0x3] ss:$9 sm:$0xff] %v1176_v45  ;;  %v749_v45 = vcvt.f32.s32 %v2655_v63 }
 0x230   : > { %1442 = vst [vmem:[#allocation1 + $0x4] ss:$9 sm:$0xff] %v1177_v39  ;;  %v736_v8 = vadd.s32 %v735_v49, %v733_v57  ;;  %v748_v39 = vcvt.f32.s32 %v747_v26 }
 0x231   : > { %1443 = vst [vmem:[#allocation1 + $0x5] ss:$9 sm:$0xff] %v1178_v23  ;;  %776 = vmin.xlane.f32.xlu0 %v775_v29  ;;  %v750_v3 = vshll.u32 %v749_v45, 16 }
 0x232   : > { %1444 = vst [vmem:[#allocation1 + $0x6] ss:$9 sm:$0xff] %v1179_v1  ;;  %v1181_v19 = vperm.slane %v736_v8, 0  ;;  %v1182_v24 = vperm.slane %v736_v8, 1  ;;  %v1183_v21 = vperm.slane %v736_v8, 2  ;;  %v1184_v28 = vperm.slane %v736_v8, 3 }
 0x233   : > { %1445 = vst [vmem:[#allocation1 + $0x7] ss:$9 sm:$0xff] %v1180_v22  ;;  %v1185_v48 = vperm.slane %v736_v8, 4  ;;  %v1186_v16 = vperm.slane %v736_v8, 5  ;;  %v1187_v4 = vperm.slane %v736_v8, 6  ;;  %v1188_v44 = vperm.slane %v736_v8, 7 }
 0x234   : > { %v751_v23 = vadd.s32 %v750_v3, %v748_v39  ;;  %v828_v3 = vand.u32 65535, %v2687_v61 }
 0x236   : > { %v1189_v57 = vperm.slane %v751_v23, 0  ;;  %v1190_v29 = vperm.slane %v751_v23, 1  ;;  %v1191_v49 = vperm.slane %v751_v23, 2  ;;  %v1192_v22 = vperm.slane %v751_v23, 3 }
 0x237   : > { %v1193_v51 = vperm.slane %v751_v23, 4  ;;  %v1194_v63 = vperm.slane %v751_v23, 5  ;;  %v1195_v8 = vperm.slane %v751_v23, 6 }
 0x239   : > { %847 = vmin.xlane.f32.xlu0 %v2712_v14 }
 0x23a   : > { %v2715_v11 = vld [vmem:[#allocation1] sm:$0xff] }
 0x23b   : > { %1447 = vst [vmem:[#allocation1] ss:$9 sm:$0xff] %v1181_v19  ;;  %v1196_v19 = vperm.slane %v751_v23, 7  ;;  %v824_v23 = vcvt.f32.s32 %v2692_v43 }
 0x23c   : > { %1448 = vst [vmem:[#allocation1 + $0x1] ss:$9 sm:$0xff] %v1182_v24  ;;  %v809_v24 = vcvt.f32.s32 %v2672_v27 }
 0x23d   : > { %1449 = vst [vmem:[#allocation1 + $0x2] ss:$9 sm:$0xff] %v1183_v21 }
 0x23e   : > { %1450 = vst [vmem:[#allocation1 + $0x3] ss:$9 sm:$0xff] %v1184_v28  ;;  %v810_v28 = vshll.u32 %v809_v24, 16  ;;  %v825_v24 = vshll.u32 %v824_v23, 16 }
 0x23f   : > { %1451 = vst [vmem:[#allocation1 + $0x4] ss:$9 sm:$0xff] %v1185_v48 }
 0x240   : > { %1452 = vst [vmem:[#allocation1 + $0x5] ss:$9 sm:$0xff] %v1186_v16 }
 0x241   : > { %1453 = vst [vmem:[#allocation1 + $0x6] ss:$9 sm:$0xff] %v1187_v4  ;;  %v764_v4 = vcvt.f32.s32 %v2668_v18 }
 0x242   : > { %1454 = vst [vmem:[#allocation1 + $0x7] ss:$9 sm:$0xff] %v1188_v44 }
 0x243   : > { %v765_v45 = vshll.u32 %v764_v4, 16  ;;  %v779_v4 = vcvt.f32.s32 %v2684_v17 }
 0x249   : > { %v2718_v1 = vld [vmem:[#allocation1] sm:$0xff] }
 0x24a   : > { %1456 = vst [vmem:[#allocation1] ss:$9 sm:$0xff] %v1189_v57 }
 0x24b   : > { %1457 = vst [vmem:[#allocation1 + $0x1] ss:$9 sm:$0xff] %v1190_v29 }
 0x24c   : > { %1458 = vst [vmem:[#allocation1 + $0x2] ss:$9 sm:$0xff] %v1191_v49 }
 0x24d   : > { %1459 = vst [vmem:[#allocation1 + $0x3] ss:$9 sm:$0xff] %v1192_v22 }
 0x24e   : > { %1460 = vst [vmem:[#allocation1 + $0x4] ss:$9 sm:$0xff] %v1193_v51 }
 0x24f   : > { %1461 = vst [vmem:[#allocation1 + $0x5] ss:$9 sm:$0xff] %v1194_v63 }
 0x250   : > { %1462 = vst [vmem:[#allocation1 + $0x6] ss:$9 sm:$0xff] %v1195_v8 }
 0x251   : > { %1463 = vst [vmem:[#allocation1 + $0x7] ss:$9 sm:$0xff] %v1196_v19  ;;  %v830_v19 = vcvt.s32.f32 %v828_v3 }
 0x258   : > { %v2726_v22 = vld [vmem:[#allocation1] sm:$0xff] }
 0x28c   : > { %v807_v21 = vpop.xlane.xlu1 %806 }
 0x28d   : > { %v808_v48 = vcvt.f32.s32 %v807_v21 }
 0x28f   : > { %v2721_v16 = vadd.s32 %v810_v28, %v808_v48 }
 0x291   : > { %v1222_v59 = vperm.slane %v2721_v16, 1  ;;  %v1223_v25 = vperm.slane %v2721_v16, 2 }
 0x294   : > { %v762_v26 = vpop.xlane.xlu1 %761 }
 0x295   : > { %v763_v44 = vcvt.f32.s32 %v762_v26  ;;  %v657_v26 = vsel %vm625_vm10, %v2500_v52, 16 }
 0x297   : > { %v766_v39 = vadd.s32 %v765_v45, %v763_v44  ;;  %v780_v44 = vshll.u32 %v779_v4, 16 }
 0x299   : > { %v1197_v57 = vperm.slane %v766_v39, 0  ;;  %v1198_v29 = vperm.slane %v766_v39, 1  ;;  %v1199_v49 = vperm.slane %v766_v39, 2  ;;  %v1200_v27 = vperm.slane %v766_v39, 3 }
 0x29a   : > { %v1201_v51 = vperm.slane %v766_v39, 4  ;;  %v1202_v63 = vperm.slane %v766_v39, 5  ;;  %v1203_v21 = vperm.slane %v766_v39, 6  ;;  %v1204_v43 = vperm.slane %v766_v39, 7 }
 0x29b   : > { %1465 = vst [vmem:[#allocation1] ss:$9 sm:$0xff] %v1197_v57  ;;  %v2739_v39 = vsel %vm514_vm1, %v657_v26, 2147483647 }
 0x29c   : > { %1466 = vst [vmem:[#allocation1 + $0x1] ss:$9 sm:$0xff] %v1198_v29  ;;  %v822_v8 = vpop.xlane.xlu0 %821  ;;  %v2728_v18 = vpop.xlane.xlu1 %832  ;;  %v859_v57 = vshra.s32 %v2739_v39, 16 }
 0x29d   : > { %1467 = vst [vmem:[#allocation1 + $0x2] ss:$9 sm:$0xff] %v1199_v49  ;;  %v823_v61 = vcvt.f32.s32 %v822_v8  ;;  %vm834_vm9 = vcmp.eq.f32.partialorder %v2694_v38, %v2728_v18  ;;  %v845_v8 = vcvt.s32.f32 %v843_v32 }
 0x29e   : > { %1468 = vst [vmem:[#allocation1 + $0x3] ss:$9 sm:$0xff] %v1200_v27  ;;  %v835_v28 = vsel %vm834_vm9, %v830_v19, inf  ;;  %v658_v27 = vsel %vm626_vm11, %v2500_v52, 16  ;;  %v861_v54 = vcvt.s32.f32 %v859_v57  ;;  %vm634_vm9 = vcmp.eq.f32.partialorder %v2441_v50, %v2592_v36 }
 0x29f   : > { %1469 = vst [vmem:[#allocation1 + $0x4] ss:$9 sm:$0xff] %v1201_v51  ;;  %v2732_v48 = vadd.s32 %v825_v24, %v823_v61  ;;  %836 = vmin.xlane.f32.xlu2 %v835_v28  ;;  %v872_v42 = vsel %vm514_vm1, %v658_v27, 2147483647  ;;  %v794_v28 = vcvt.f32.s32 %v2662_v56  ;;  %v858_v27 = vand.u32 65535, %v2739_v39 }
 0x2a0   : > { %1470 = vst [vmem:[#allocation1 + $0x5] ss:$9 sm:$0xff] %v1202_v63  ;;  %v660_v39 = vsel %vm628_vm15, %v2500_v52, 16 }
 0x2a1   : > { %1471 = vst [vmem:[#allocation1 + $0x6] ss:$9 sm:$0xff] %v1203_v21  ;;  %v874_v21 = vshra.s32 %v872_v42, 16  ;;  %v795_v4 = vshll.u32 %v794_v28, 16  ;;  %v1221_v28 = vperm.slane %v2721_v16, 0 }
 0x2a2   : > { %1472 = vst [vmem:[#allocation1 + $0x7] ss:$9 sm:$0xff] %v1204_v43  ;;  %v2783_v37 = vsel %vm514_vm1, %v660_v39, 2147483647  ;;  %v1235_v39 = vperm.slane %v2732_v48, 6 }
 0x2a3   : > { %v876_v61 = vcvt.s32.f32 %v874_v21  ;;  %v662_v21 = vsel %vm630_vm0, %v2500_v52, 16  ;;  %vm635_vm0 = vcmp.eq.f32.partialorder %v2465_v12, %v2569_v58 }
 0x2a4   : > { %v777_v45 = vpop.xlane.xlu0 %776 }
 0x2a5   : > { %v778_v38 = vcvt.f32.s32 %v777_v45 }
 0x2a7   : > { %v781_v3 = vadd.s32 %v780_v44, %v778_v38  ;;  %791 = vmin.xlane.f32.xlu2 %v2666_v55 }
 0x2a9   : > { %v1205_v40 = vperm.slane %v781_v3, 0  ;;  %v1206_v17 = vperm.slane %v781_v3, 1  ;;  %v1207_v23 = vperm.slane %v781_v3, 2  ;;  %v2746_v29 = vld [vmem:[#allocation1] sm:$0xff]  ;;  %v1208_v49 = vperm.slane %v781_v3, 3 }
 0x2aa   : > { %v1209_v51 = vperm.slane %v781_v3, 4  ;;  %v1210_v63 = vperm.slane %v781_v3, 5  ;;  %v1211_v62 = vperm.slane %v781_v3, 6  ;;  %v1212_v19 = vperm.slane %v781_v3, 7 }
 0x2ab   : > { %1474 = vst [vmem:[#allocation1] ss:$9 sm:$0xff] %v1205_v40 }
 0x2ac   : > { %1475 = vst [vmem:[#allocation1 + $0x1] ss:$9 sm:$0xff] %v1206_v17  ;;  %v2749_v55 = vpop.xlane.xlu0 %847 }
 0x2ad   : > { %1476 = vst [vmem:[#allocation1 + $0x2] ss:$9 sm:$0xff] %v1207_v23  ;;  %vm849_vm12 = vcmp.eq.f32.partialorder %v2712_v14, %v2749_v55 }
 0x2ae   : > { %1477 = vst [vmem:[#allocation1 + $0x3] ss:$9 sm:$0xff] %v1208_v49  ;;  %v850_v24 = vsel %vm849_vm12, %v845_v8, inf  ;;  %v860_v8 = vcvt.s32.f32 %v858_v27  ;;  %v1230_v27 = vperm.slane %v2732_v48, 1  ;;  %vm633_vm12 = vcmp.eq.f32.partialorder %v2423_v31, %v2571_v5 }
 0x2af   : > { %1478 = vst [vmem:[#allocation1 + $0x4] ss:$9 sm:$0xff] %v1209_v51  ;;  %851 = vmin.xlane.f32.xlu1 %v850_v24  ;;  %862 = vmin.xlane.f32.xlu2 %v861_v54 }
 0x2b0   : > { %1479 = vst [vmem:[#allocation1 + $0x5] ss:$9 sm:$0xff] %v1210_v63  ;;  %v659_v63 = vsel %vm627_vm13, %v2500_v52, 16 }
 0x2b1   : > { %1480 = vst [vmem:[#allocation1 + $0x6] ss:$9 sm:$0xff] %v1211_v62  ;;  %v2769_v13 = vsel %vm514_vm1, %v659_v63, 2147483647  ;;  %v873_v62 = vand.u32 65535, %v872_v42  ;;  %v1231_v63 = vperm.slane %v2732_v48, 2 }
 0x2b2   : > { %1481 = vst [vmem:[#allocation1 + $0x7] ss:$9 sm:$0xff] %v1212_v19  ;;  %v889_v19 = vshra.s32 %v2769_v13, 16 }
 0x2b3   : > { %v875_v24 = vcvt.s32.f32 %v873_v62  ;;  %v839_v62 = vcvt.f32.s32 %v2728_v18 }
 0x2b7   : > { %877 = vmin.xlane.f32.xlu1 %v876_v61 }
 0x2b9   : > { %v2757_v32 = vld [vmem:[#allocation1] sm:$0xff] }
 0x312   : > { %v2754_v43 = vpop.xlane.xlu2 %836 }
 0x31a   : > { %v792_v14 = vpop.xlane.xlu2 %791 }
 0x31b   : > { %v793_v26 = vcvt.f32.s32 %v792_v14  ;;  %v2789_v14 = vcvt.s32.f32 %v889_v19  ;;  %v1236_v19 = vperm.slane %v2732_v48, 7 }
 0x31d   : > { %v796_v45 = vadd.s32 %v795_v4, %v793_v26  ;;  %v2792_v4 = vsel %vm514_vm1, %v662_v21, 2147483647  ;;  %v1224_v26 = vperm.slane %v2721_v16, 3  ;;  %v840_v21 = vshll.u32 %v839_v62, 16 }
 0x31f   : > { %v1213_v44 = vperm.slane %v796_v45, 0  ;;  %v1214_v38 = vperm.slane %v796_v45, 1  ;;  %v1215_v3 = vperm.slane %v796_v45, 2  ;;  %v1216_v40 = vperm.slane %v796_v45, 3 }
 0x320   : > { %v1217_v17 = vperm.slane %v796_v45, 4  ;;  %v1218_v23 = vperm.slane %v796_v45, 5  ;;  %v1219_v57 = vperm.slane %v796_v45, 6  ;;  %v1220_v51 = vperm.slane %v796_v45, 7 }
 0x321   : > { %1483 = vst [vmem:[#allocation1] ss:$9 sm:$0xff] %v1213_v44  ;;  %v904_v45 = vshra.s32 %v2783_v37, 16  ;;  %v1226_v44 = vperm.slane %v2721_v16, 5 }
 0x322   : > { %1484 = vst [vmem:[#allocation1 + $0x1] ss:$9 sm:$0xff] %v1214_v38  ;;  %v2761_v56 = vpop.xlane.xlu2 %862  ;;  %v2763_v49 = vpop.xlane.xlu1 %851  ;;  %v1227_v38 = vperm.slane %v2721_v16, 6 }
 0x323   : > { %1485 = vst [vmem:[#allocation1 + $0x2] ss:$9 sm:$0xff] %v1215_v3  ;;  %vm864_vm14 = vcmp.eq.f32.partialorder %v861_v54, %v2761_v56  ;;  %v934_v3 = vshra.s32 %v2792_v4, 16 }
 0x324   : > { %1486 = vst [vmem:[#allocation1 + $0x3] ss:$9 sm:$0xff] %v1216_v40  ;;  %v865_v41 = vsel %vm864_vm14, %v860_v8, inf  ;;  %v1228_v40 = vperm.slane %v2721_v16, 7  ;;  %v1233_v8 = vperm.slane %v2732_v48, 4  ;;  %vm636_vm14 = vcmp.eq.f32.partialorder %v2480_v33, %v2594_v9 }
 0x325   : > { %1487 = vst [vmem:[#allocation1 + $0x4] ss:$9 sm:$0xff] %v1217_v17  ;;  %866 = vmin.xlane.f32.xlu0 %v865_v41  ;;  %v2802_v17 = vcvt.s32.f32 %v904_v45  ;;  %v1234_v41 = vperm.slane %v2732_v48, 5  ;;  %v854_v45 = vcvt.f32.s32 %v2749_v55 }
 0x326   : > { %1488 = vst [vmem:[#allocation1 + $0x5] ss:$9 sm:$0xff] %v1218_v23  ;;  %v2804_v23 = vcvt.s32.f32 %v934_v3 }
 0x327   : > { %1489 = vst [vmem:[#allocation1 + $0x6] ss:$9 sm:$0xff] %v1219_v57  ;;  %v1229_v57 = vperm.slane %v2732_v48, 0  ;;  %v855_v3 = vshll.u32 %v854_v45, 16 }
 0x328   : > { %1490 = vst [vmem:[#allocation1 + $0x7] ss:$9 sm:$0xff] %v1220_v51 }
 0x32a   : > { %v2777_v54 = vpop.xlane.xlu1 %877 }
 0x32b   : > { %vm879_vm2 = vcmp.eq.f32.partialorder %v876_v61, %v2777_v54  ;;  %v1225_v61 = vperm.slane %v2721_v16, 4  ;;  %v1232_v16 = vperm.slane %v2732_v48, 3 }
 0x32c   : > { %v880_v47 = vsel %vm879_vm2, %v875_v24, inf  ;;  %v838_v24 = vcvt.f32.s32 %v2754_v43 }
 0x32d   : > { %881 = vmin.xlane.f32.xlu2 %v880_v47  ;;  %892 = vmin.xlane.f32.xlu0 %v2789_v14 }
 0x32f   : > { %v2786_v42 = vld [vmem:[#allocation1] sm:$0xff] }
 0x330   : > { %1492 = vst [vmem:[#allocation1] ss:$9 sm:$0xff] %v1221_v28  ;;  %v841_v28 = vadd.s32 %v840_v21, %v838_v24 }
 0x331   : > { %1493 = vst [vmem:[#allocation1 + $0x1] ss:$9 sm:$0xff] %v1222_v59 }
 0x332   : > { %1494 = vst [vmem:[#allocation1 + $0x2] ss:$9 sm:$0xff] %v1223_v25  ;;  %v1237_v59 = vperm.slane %v841_v28, 0  ;;  %v1238_v47 = vperm.slane %v841_v28, 1  ;;  %v1240_v18 = vperm.slane %v841_v28, 3  ;;  %v1242_v48 = vperm.slane %v841_v28, 5 }
 0x333   : > { %1495 = vst [vmem:[#allocation1 + $0x3] ss:$9 sm:$0xff] %v1224_v26  ;;  %v1239_v26 = vperm.slane %v841_v28, 2  ;;  %v1243_v43 = vperm.slane %v841_v28, 6 }
 0x334   : > { %1496 = vst [vmem:[#allocation1 + $0x4] ss:$9 sm:$0xff] %v1225_v61  ;;  %v1241_v61 = vperm.slane %v841_v28, 4 }
 0x335   : > { %1497 = vst [vmem:[#allocation1 + $0x5] ss:$9 sm:$0xff] %v1226_v44  ;;  %907 = vmin.xlane.f32.xlu2 %v2802_v17  ;;  %937 = vmin.xlane.f32.xlu0 %v2804_v23  ;;  %v1244_v44 = vperm.slane %v841_v28, 7 }
 0x336   : > { %1498 = vst [vmem:[#allocation1 + $0x6] ss:$9 sm:$0xff] %v1227_v38  ;;  %v853_v38 = vcvt.f32.s32 %v2763_v49  ;;  %v869_v49 = vcvt.f32.s32 %v2761_v56 }
 0x337   : > { %1499 = vst [vmem:[#allocation1 + $0x7] ss:$9 sm:$0xff] %v1228_v40 }
 0x338   : > { %v856_v40 = vadd.s32 %v855_v3, %v853_v38  ;;  %v870_v24 = vshll.u32 %v869_v49, 16  ;;  %v933_v49 = vand.u32 65535, %v2792_v4 }
 0x33a   : > { %v1249_v55 = vperm.slane %v856_v40, 4  ;;  %v1251_v62 = vperm.slane %v856_v40, 6  ;;  %v935_v30 = vcvt.s32.f32 %v933_v49 }
 0x33e   : > { %v2810_v51 = vld [vmem:[#allocation1] sm:$0xff] }
 0x33f   : > { %1501 = vst [vmem:[#allocation1] ss:$9 sm:$0xff] %v1229_v57  ;;  %v1245_v57 = vperm.slane %v856_v40, 0 }
 0x340   : > { %1502 = vst [vmem:[#allocation1 + $0x1] ss:$9 sm:$0xff] %v1230_v27 }
 0x341   : > { %1503 = vst [vmem:[#allocation1 + $0x2] ss:$9 sm:$0xff] %v1231_v63  ;;  %v1246_v63 = vperm.slane %v856_v40, 1 }
 0x342   : > { %1504 = vst [vmem:[#allocation1 + $0x3] ss:$9 sm:$0xff] %v1232_v16  ;;  %v1247_v16 = vperm.slane %v856_v40, 2 }
 0x343   : > { %1505 = vst [vmem:[#allocation1 + $0x4] ss:$9 sm:$0xff] %v1233_v8  ;;  %v1248_v8 = vperm.slane %v856_v40, 3 }
 0x344   : > { %1506 = vst [vmem:[#allocation1 + $0x5] ss:$9 sm:$0xff] %v1234_v41  ;;  %v1250_v41 = vperm.slane %v856_v40, 5 }
 0x345   : > { %1507 = vst [vmem:[#allocation1 + $0x6] ss:$9 sm:$0xff] %v1235_v39  ;;  %v1252_v39 = vperm.slane %v856_v40, 7 }
 0x346   : > { %1508 = vst [vmem:[#allocation1 + $0x7] ss:$9 sm:$0xff] %v1236_v19 }
 0x34d   : > { %v2820_v25 = vld [vmem:[#allocation1] sm:$0xff] }
 0x34e   : > { %1510 = vst [vmem:[#allocation1] ss:$9 sm:$0xff] %v1237_v59  ;;  %v888_v59 = vand.u32 65535, %v2769_v13 }
 0x34f   : > { %1511 = vst [vmem:[#allocation1 + $0x1] ss:$9 sm:$0xff] %v1238_v47 }
 0x350   : > { %1512 = vst [vmem:[#allocation1 + $0x2] ss:$9 sm:$0xff] %v1239_v26  ;;  %v890_v40 = vcvt.s32.f32 %v888_v59 }
 0x351   : > { %1513 = vst [vmem:[#allocation1 + $0x3] ss:$9 sm:$0xff] %v1240_v18 }
 0x352   : > { %1514 = vst [vmem:[#allocation1 + $0x4] ss:$9 sm:$0xff] %v1241_v61 }
 0x353   : > { %1515 = vst [vmem:[#allocation1 + $0x5] ss:$9 sm:$0xff] %v1242_v48  ;;  %v661_v48 = vsel %vm629_vm3, %v2500_v52, 16  ;;  %vm638_vm3 = vcmp.eq.f32.partialorder %v2363_v46, %v2517_v2 }
 0x354   : > { %1516 = vst [vmem:[#allocation1 + $0x6] ss:$9 sm:$0xff] %v1243_v43  ;;  %v917_v60 = vsel %vm514_vm1, %v661_v48, 2147483647 }
 0x355   : > { %1517 = vst [vmem:[#allocation1 + $0x7] ss:$9 sm:$0xff] %v1244_v44  ;;  %v884_v44 = vcvt.f32.s32 %v2777_v54  ;;  %v919_v54 = vshra.s32 %v917_v60, 16 }
 0x35c   : > { %v2824_v27 = vld [vmem:[#allocation1] sm:$0xff] }
 0x35d   : > { %1519 = vst [vmem:[#allocation1] ss:$9 sm:$0xff] %v1245_v57 }
 0x35e   : > { %1520 = vst [vmem:[#allocation1 + $0x1] ss:$9 sm:$0xff] %v1246_v63 }
 0x35f   : > { %1521 = vst [vmem:[#allocation1 + $0x2] ss:$9 sm:$0xff] %v1247_v16  ;;  %v885_v16 = vshll.u32 %v884_v44, 16 }
 0x360   : > { %1522 = vst [vmem:[#allocation1 + $0x3] ss:$9 sm:$0xff] %v1248_v8 }
 0x361   : > { %1523 = vst [vmem:[#allocation1 + $0x4] ss:$9 sm:$0xff] %v1249_v55  ;;  %v921_v55 = vcvt.s32.f32 %v919_v54 }
 0x362   : > { %1524 = vst [vmem:[#allocation1 + $0x5] ss:$9 sm:$0xff] %v1250_v41 }
 0x363   : > { %1525 = vst [vmem:[#allocation1 + $0x6] ss:$9 sm:$0xff] %v1251_v62 }
 0x364   : > { %1526 = vst [vmem:[#allocation1 + $0x7] ss:$9 sm:$0xff] %v1252_v39 }
 0x36b   : > { %v2830_v61 = vld [vmem:[#allocation1] sm:$0xff] }
 0x398   : > { %v867_v19 = vpop.xlane.xlu0 %866 }
 0x399   : > { %v868_v21 = vcvt.f32.s32 %v867_v19 }
 0x39b   : > { %v871_v28 = vadd.s32 %v870_v24, %v868_v21 }
 0x39d   : > { %v1253_v47 = vperm.slane %v871_v28, 0  ;;  %v1254_v26 = vperm.slane %v871_v28, 1  ;;  %v1255_v18 = vperm.slane %v871_v28, 2  ;;  %v1256_v45 = vperm.slane %v871_v28, 3 }
 0x39e   : > { %v1257_v43 = vperm.slane %v871_v28, 4  ;;  %v1258_v38 = vperm.slane %v871_v28, 5  ;;  %v1259_v34 = vperm.slane %v871_v28, 6  ;;  %v1260_v13 = vperm.slane %v871_v28, 7 }
 0x39f   : > { %1528 = vst [vmem:[#allocation1] ss:$9 sm:$0xff] %v1253_v47  ;;  %v664_v28 = vsel %vm632_vm5, %v2500_v52, 16 }
 0x3a0   : > { %v882_v56 = vpop.xlane.xlu2 %881  ;;  %1529 = vst [vmem:[#allocation1 + $0x1] ss:$9 sm:$0xff] %v1254_v26  ;;  %v893_v3 = vpop.xlane.xlu0 %892  ;;  %v962_v26 = vsel %vm514_vm1, %v664_v28, 2147483647 }
 0x3a1   : > { %1530 = vst [vmem:[#allocation1 + $0x2] ss:$9 sm:$0xff] %v1255_v18  ;;  %vm894_vm4 = vcmp.eq.f32.partialorder %v2789_v14, %v893_v3  ;;  %v883_v57 = vcvt.f32.s32 %v882_v56  ;;  %v964_v18 = vshra.s32 %v962_v26, 16  ;;  %v899_v48 = vcvt.f32.s32 %v893_v3 }
 0x3a2   : > { %1531 = vst [vmem:[#allocation1 + $0x3] ss:$9 sm:$0xff] %v1256_v45  ;;  %v895_v63 = vsel %vm894_vm4, %v890_v40, inf  ;;  %vm637_vm4 = vcmp.eq.f32.partialorder %v2353_v35, %v2514_v0 }
 0x3a3   : > { %1532 = vst [vmem:[#allocation1 + $0x4] ss:$9 sm:$0xff] %v1257_v43  ;;  %896 = vmin.xlane.f32.xlu1 %v895_v63  ;;  %v886_v8 = vadd.s32 %v885_v16, %v883_v57  ;;  %v966_v45 = vcvt.s32.f32 %v964_v18  ;;  %v900_v56 = vshll.u32 %v899_v48, 16  ;;  %v663_v16 = vsel %vm631_vm7, %v2500_v52, 16 }
 0x3a4   : > { %1533 = vst [vmem:[#allocation1 + $0x5] ss:$9 sm:$0xff] %v1258_v38  ;;  %v918_v38 = vand.u32 65535, %v917_v60  ;;  %v947_v6 = vsel %vm514_vm1, %v663_v16, 2147483647 }
 0x3a5   : > { %1534 = vst [vmem:[#allocation1 + $0x6] ss:$9 sm:$0xff] %v1259_v34  ;;  %v1261_v41 = vperm.slane %v886_v8, 0  ;;  %v1262_v62 = vperm.slane %v886_v8, 1  ;;  %v1263_v14 = vperm.slane %v886_v8, 2  ;;  %v1264_v24 = vperm.slane %v886_v8, 3 }
 0x3a6   : > { %1535 = vst [vmem:[#allocation1 + $0x7] ss:$9 sm:$0xff] %v1260_v13  ;;  %v1265_v21 = vperm.slane %v886_v8, 4  ;;  %v1266_v59 = vperm.slane %v886_v8, 5  ;;  %v1267_v47 = vperm.slane %v886_v8, 6  ;;  %v1268_v15 = vperm.slane %v886_v8, 7 }
 0x3a8   : > { %v2838_v39 = vpop.xlane.xlu0 %937  ;;  %v908_v18 = vpop.xlane.xlu2 %907 }
 0x3a9   : > { %vm939_vm6 = vcmp.eq.f32.partialorder %v2804_v23, %v2838_v39  ;;  %vm909_vm13 = vcmp.eq.f32.partialorder %v2802_v17, %v908_v18  ;;  %v914_v9 = vcvt.f32.s32 %v908_v18  ;;  %v667_v18 = vsel %vm635_vm0, %v2500_v52, 16 }
 0x3aa   : > { %v940_v4 = vsel %vm939_vm6, %v935_v30, inf  ;;  %v2899_v12 = vsel %vm514_vm1, %v667_v18, 2147483647 }
 0x3ab   : > { %922 = vmin.xlane.f32.xlu1 %v921_v55 }
 0x3ad   : > { %v2841_v19 = vld [vmem:[#allocation1] sm:$0xff] }
 0x3ae   : > { %1537 = vst [vmem:[#allocation1] ss:$9 sm:$0xff] %v1261_v41  ;;  %v920_v41 = vcvt.s32.f32 %v918_v38  ;;  %v903_v38 = vand.u32 65535, %v2783_v37  ;;  %v668_v37 = vsel %vm636_vm14, %v2500_v52, 16 }
 0x3af   : > { %1538 = vst [vmem:[#allocation1 + $0x1] ss:$9 sm:$0xff] %v1262_v62 }
 0x3b0   : > { %1539 = vst [vmem:[#allocation1 + $0x2] ss:$9 sm:$0xff] %v1263_v14  ;;  %v949_v14 = vshra.s32 %v947_v6, 16 }
 0x3b1   : > { %1540 = vst [vmem:[#allocation1 + $0x3] ss:$9 sm:$0xff] %v1264_v24 }
 0x3b2   : > { %1541 = vst [vmem:[#allocation1 + $0x4] ss:$9 sm:$0xff] %v1265_v21  ;;  %v951_v24 = vcvt.s32.f32 %v949_v14  ;;  %v963_v21 = vand.u32 65535, %v962_v26  ;;  %v948_v26 = vand.u32 65535, %v947_v6 }
 0x3b3   : > { %1542 = vst [vmem:[#allocation1 + $0x5] ss:$9 sm:$0xff] %v1266_v59  ;;  %941 = vmin.xlane.f32.xlu1 %v940_v4 }
 0x3b4   : > { %1543 = vst [vmem:[#allocation1 + $0x6] ss:$9 sm:$0xff] %v1267_v47  ;;  %v965_v59 = vcvt.s32.f32 %v963_v21 }
 0x3b5   : > { %1544 = vst [vmem:[#allocation1 + $0x7] ss:$9 sm:$0xff] %v1268_v15 }
 0x3bb   : > { %967 = vmin.xlane.f32.xlu1 %v966_v45 }
 0x3bc   : > { %v2849_v57 = vld [vmem:[#allocation1] sm:$0xff] }
 0x416   : > { %v897_v43 = vpop.xlane.xlu1 %896 }
 0x417   : > { %v898_v23 = vcvt.f32.s32 %v897_v43 }
 0x419   : > { %v901_v44 = vadd.s32 %v900_v56, %v898_v23 }
 0x41b   : > { %v1269_v40 = vperm.slane %v901_v44, 0  ;;  %v1270_v34 = vperm.slane %v901_v44, 1  ;;  %v1271_v13 = vperm.slane %v901_v44, 2  ;;  %v1272_v63 = vperm.slane %v901_v44, 3 }
 0x41c   : > { %v1273_v54 = vperm.slane %v901_v44, 4  ;;  %v1274_v8 = vperm.slane %v901_v44, 5  ;;  %v1275_v62 = vperm.slane %v901_v44, 6  ;;  %v1276_v7 = vperm.slane %v901_v44, 7 }
 0x41d   : > { %1546 = vst [vmem:[#allocation1] ss:$9 sm:$0xff] %v1269_v40  ;;  %v950_v44 = vcvt.s32.f32 %v948_v26  ;;  %v665_v40 = vsel %vm633_vm12, %v2500_v52, 16 }
 0x41e   : > { %1547 = vst [vmem:[#allocation1 + $0x1] ss:$9 sm:$0xff] %v1270_v34  ;;  %v923_v3 = vpop.xlane.xlu1 %922  ;;  %v905_v34 = vcvt.s32.f32 %v903_v38 }
 0x41f   : > { %1548 = vst [vmem:[#allocation1 + $0x2] ss:$9 sm:$0xff] %v1271_v13  ;;  %vm924_vm8 = vcmp.eq.f32.partialorder %v921_v55, %v923_v3  ;;  %v666_v55 = vsel %vm634_vm9, %v2500_v52, 16  ;;  %v929_v48 = vcvt.f32.s32 %v923_v3  ;;  %v977_v13 = vsel %vm514_vm1, %v665_v40, 2147483647 }
 0x420   : > { %1549 = vst [vmem:[#allocation1 + $0x3] ss:$9 sm:$0xff] %v1272_v63  ;;  %v925_v60 = vsel %vm924_vm8, %v920_v41, inf  ;;  %v992_v47 = vsel %vm514_vm1, %v666_v55, 2147483647  ;;  %v910_v16 = vsel %vm909_vm13, %v905_v34, inf }
 0x421   : > { %1550 = vst [vmem:[#allocation1 + $0x4] ss:$9 sm:$0xff] %v1273_v54  ;;  %926 = vmin.xlane.f32.xlu2 %v925_v60  ;;  %v994_v15 = vshra.s32 %v992_v47, 16  ;;  %v930_v56 = vshll.u32 %v929_v48, 16  ;;  %v979_v54 = vshra.s32 %v977_v13, 16  ;;  %v993_v5 = vand.u32 65535, %v992_v47 }
 0x422   : > { %1551 = vst [vmem:[#allocation1 + $0x5] ss:$9 sm:$0xff] %v1274_v8  ;;  %v2882_v3 = vsel %vm514_vm1, %v668_v37, 2147483647  ;;  %v915_v60 = vshll.u32 %v914_v9, 16 }
 0x423   : > { %1552 = vst [vmem:[#allocation1 + $0x6] ss:$9 sm:$0xff] %v1275_v62  ;;  %v996_v4 = vcvt.s32.f32 %v994_v15  ;;  %v981_v8 = vcvt.s32.f32 %v979_v54  ;;  %v995_v17 = vcvt.s32.f32 %v993_v5  ;;  %v1024_v62 = vshra.s32 %v2882_v3, 16 }
 0x424   : > { %1553 = vst [vmem:[#allocation1 + $0x7] ss:$9 sm:$0xff] %v1276_v7  ;;  %v944_v5 = vcvt.f32.s32 %v2838_v39 }
 0x425   : > { %v2885_v6 = vcvt.s32.f32 %v1024_v62 }
 0x426   : > { %v2853_v49 = vpop.xlane.xlu1 %941 }
 0x429   : > { %952 = vmin.xlane.f32.xlu2 %v951_v24 }
 0x42b   : > { %v2890_v47 = vld [vmem:[#allocation1] sm:$0xff] }
 0x42e   : > { %v2858_v28 = vpop.xlane.xlu1 %967 }
 0x42f   : > { %vm969_vm10 = vcmp.eq.f32.partialorder %v966_v45, %v2858_v28 }
 0x430   : > { %v970_v30 = vsel %vm969_vm10, %v965_v59, inf }
 0x431   : > { %971 = vmin.xlane.f32.xlu2 %v970_v30 }
 0x439   : > { %997 = vmin.xlane.f32.xlu2 %v996_v4 }
 0x494   : > { %v927_v43 = vpop.xlane.xlu2 %926 }
 0x495   : > { %v928_v50 = vcvt.f32.s32 %v927_v43 }
 0x497   : > { %v2862_v36 = vadd.s32 %v930_v56, %v928_v50 }
 0x499   : > { %v1285_v38 = vperm.slane %v2862_v36, 0  ;;  %v1287_v54 = vperm.slane %v2862_v36, 2  ;;  %v1288_v46 = vperm.slane %v2862_v36, 3  ;;  %v1289_v2 = vperm.slane %v2862_v36, 4 }
 0x49a   : > { %v1290_v37 = vperm.slane %v2862_v36, 5  ;;  %v1292_v62 = vperm.slane %v2862_v36, 7 }
 0x49c   : > { %v2864_v23 = vpop.xlane.xlu2 %952 }
 0x49d   : > { %vm954_vm11 = vcmp.eq.f32.partialorder %v951_v24, %v2864_v23 }
 0x49e   : > { %v955_v45 = vsel %vm954_vm11, %v950_v44, inf  ;;  %v1009_v44 = vshra.s32 %v2899_v12, 16 }
 0x49f   : > { %956 = vmin.xlane.f32.xlu0 %v955_v45  ;;  %v670_v45 = vsel %vm638_vm3, %v2500_v52, 16 }
 0x4a0   : > { %v2906_v40 = vcvt.s32.f32 %v1009_v44  ;;  %v2909_v34 = vsel %vm514_vm1, %v670_v45, 2147483647  ;;  %v974_v45 = vcvt.f32.s32 %v2858_v28 }
 0x4a4   : > { %v2873_v63 = vpop.xlane.xlu2 %971 }
 0x4a7   : > { %911 = vmin.xlane.f32.xlu0 %v910_v16 }
 0x4ac   : > { %v2877_v31 = vpop.xlane.xlu2 %997 }
 0x4ad   : > { %vm999_vm15 = vcmp.eq.f32.partialorder %v996_v4, %v2877_v31  ;;  %v978_v4 = vand.u32 65535, %v977_v13  ;;  %v1286_v13 = vperm.slane %v2862_v36, 1  ;;  %v1004_v0 = vcvt.f32.s32 %v2877_v31 }
 0x4ae   : > { %v1000_v41 = vsel %vm999_vm15, %v995_v17, inf  ;;  %v1291_v17 = vperm.slane %v2862_v36, 6 }
 0x4af   : > { %982 = vmin.xlane.f32.xlu0 %v981_v8  ;;  %v980_v26 = vcvt.s32.f32 %v978_v4 }
 0x4b7   : > { %1001 = vmin.xlane.f32.xlu0 %v1000_v41  ;;  %v943_v41 = vcvt.f32.s32 %v2853_v49 }
 0x4bf   : > { %1027 = vmin.xlane.f32.xlu0 %v2885_v6 }
 0x512   : > { %v2888_v33 = vpop.xlane.xlu0 %956 }
 0x513   : > { %v958_v4 = vcvt.f32.s32 %v2888_v33 }
 0x51a   : > { %v912_v7 = vpop.xlane.xlu0 %911 }
 0x51b   : > { %v913_v14 = vcvt.f32.s32 %v912_v7  ;;  %v945_v7 = vshll.u32 %v944_v5, 16 }
 0x51d   : > { %v916_v24 = vadd.s32 %v915_v60, %v913_v14  ;;  %v946_v60 = vadd.s32 %v945_v7, %v943_v41 }
 0x51f   : > { %v1277_v21 = vperm.slane %v916_v24, 0  ;;  %v1278_v55 = vperm.slane %v916_v24, 1  ;;  %v1279_v59 = vperm.slane %v916_v24, 2  ;;  %v1280_v30 = vperm.slane %v916_v24, 3 }
 0x520   : > { %v1281_v15 = vperm.slane %v916_v24, 4  ;;  %v1282_v48 = vperm.slane %v916_v24, 5  ;;  %v1283_v43 = vperm.slane %v916_v24, 6  ;;  %v1284_v56 = vperm.slane %v916_v24, 7 }
 0x521   : > { %1555 = vst [vmem:[#allocation1] ss:$9 sm:$0xff] %v1277_v21  ;;  %v1293_v39 = vperm.slane %v946_v60, 0  ;;  %v1294_v14 = vperm.slane %v946_v60, 1  ;;  %v1295_v21 = vperm.slane %v946_v60, 2  ;;  %v1297_v49 = vperm.slane %v946_v60, 4 }
 0x522   : > { %1556 = vst [vmem:[#allocation1 + $0x1] ss:$9 sm:$0xff] %v1278_v55  ;;  %v2895_v50 = vpop.xlane.xlu0 %982  ;;  %v1296_v55 = vperm.slane %v946_v60, 3  ;;  %v1298_v36 = vperm.slane %v946_v60, 5 }
 0x523   : > { %1557 = vst [vmem:[#allocation1 + $0x2] ss:$9 sm:$0xff] %v1279_v59  ;;  %vm984_vm2 = vcmp.eq.f32.partialorder %v981_v8, %v2895_v50  ;;  %v1054_v8 = vshra.s32 %v2909_v34, 16  ;;  %v959_v59 = vcvt.f32.s32 %v2864_v23 }
 0x524   : > { %1558 = vst [vmem:[#allocation1 + $0x3] ss:$9 sm:$0xff] %v1280_v30  ;;  %v985_v58 = vsel %vm984_vm2, %v980_v26, inf  ;;  %v1299_v30 = vperm.slane %v946_v60, 6 }
 0x525   : > { %1559 = vst [vmem:[#allocation1 + $0x4] ss:$9 sm:$0xff] %v1281_v15  ;;  %986 = vmin.xlane.f32.xlu1 %v985_v58  ;;  %v2924_v9 = vcvt.s32.f32 %v1054_v8  ;;  %v1300_v15 = vperm.slane %v946_v60, 7  ;;  %v989_v60 = vcvt.f32.s32 %v2895_v50 }
 0x526   : > { %1560 = vst [vmem:[#allocation1 + $0x5] ss:$9 sm:$0xff] %v1282_v48  ;;  %v960_v48 = vshll.u32 %v959_v59, 16 }
 0x527   : > { %1561 = vst [vmem:[#allocation1 + $0x6] ss:$9 sm:$0xff] %v1283_v43 }
 0x528   : > { %1562 = vst [vmem:[#allocation1 + $0x7] ss:$9 sm:$0xff] %v1284_v56  ;;  %v961_v43 = vadd.s32 %v960_v48, %v958_v4  ;;  %v669_v48 = vsel %vm637_vm4, %v2500_v52, 16 }
 0x529   : > { %v2946_v35 = vsel %vm514_vm1, %v669_v48, 2147483647 }
 0x52a   : > { %v1301_v18 = vperm.slane %v961_v43, 0  ;;  %v1302_v56 = vperm.slane %v961_v43, 1  ;;  %v1303_v58 = vperm.slane %v961_v43, 2  ;;  %v1304_v44 = vperm.slane %v961_v43, 3 }
 0x52b   : > { %v1305_v23 = vperm.slane %v961_v43, 4  ;;  %v1307_v33 = vperm.slane %v961_v43, 6  ;;  %v1038_v48 = vand.u32 65535, %v2946_v35 }
 0x52d   : > { %1012 = vmin.xlane.f32.xlu1 %v2906_v40 }
 0x52f   : > { %v2912_v16 = vld [vmem:[#allocation1] sm:$0xff] }
 0x530   : > { %1564 = vst [vmem:[#allocation1] ss:$9 sm:$0xff] %v1285_v38  ;;  %v1306_v38 = vperm.slane %v961_v43, 5 }
 0x531   : > { %1565 = vst [vmem:[#allocation1 + $0x1] ss:$9 sm:$0xff] %v1286_v13  ;;  %v973_v13 = vcvt.f32.s32 %v2873_v63 }
 0x532   : > { %1566 = vst [vmem:[#allocation1 + $0x2] ss:$9 sm:$0xff] %v1287_v54  ;;  %v1308_v54 = vperm.slane %v961_v43, 7 }
 0x533   : > { %1567 = vst [vmem:[#allocation1 + $0x3] ss:$9 sm:$0xff] %v1288_v46  ;;  %v975_v46 = vshll.u32 %v974_v45, 16 }
 0x534   : > { %1568 = vst [vmem:[#allocation1 + $0x4] ss:$9 sm:$0xff] %v1289_v2 }
 0x535   : > { %1569 = vst [vmem:[#allocation1 + $0x5] ss:$9 sm:$0xff] %v1290_v37  ;;  %1057 = vmin.xlane.f32.xlu1 %v2924_v9  ;;  %v976_v2 = vadd.s32 %v975_v46, %v973_v13 }
 0x536   : > { %1570 = vst [vmem:[#allocation1 + $0x6] ss:$9 sm:$0xff] %v1291_v17 }
 0x537   : > { %1571 = vst [vmem:[#allocation1 + $0x7] ss:$9 sm:$0xff] %v1292_v62  ;;  %v1309_v8 = vperm.slane %v976_v2, 0  ;;  %v1310_v5 = vperm.slane %v976_v2, 1  ;;  %v1311_v17 = vperm.slane %v976_v2, 2  ;;  %v1312_v41 = vperm.slane %v976_v2, 3 }
 0x538   : > { %v1313_v28 = vperm.slane %v976_v2, 4  ;;  %v1314_v62 = vperm.slane %v976_v2, 5  ;;  %v1315_v7 = vperm.slane %v976_v2, 6  ;;  %v1316_v63 = vperm.slane %v976_v2, 7 }
 0x539   : > { %v1053_v2 = vand.u32 65535, %v2909_v34 }
 0x53e   : > { %v2927_v24 = vld [vmem:[#allocation1] sm:$0xff] }
 0x53f   : > { %1573 = vst [vmem:[#allocation1] ss:$9 sm:$0xff] %v1293_v39 }
 0x540   : > { %1574 = vst [vmem:[#allocation1 + $0x1] ss:$9 sm:$0xff] %v1294_v14  ;;  %v990_v14 = vshll.u32 %v989_v60, 16 }
 0x541   : > { %1575 = vst [vmem:[#allocation1 + $0x2] ss:$9 sm:$0xff] %v1295_v21 }
 0x542   : > { %1576 = vst [vmem:[#allocation1 + $0x3] ss:$9 sm:$0xff] %v1296_v55 }
 0x543   : > { %1577 = vst [vmem:[#allocation1 + $0x4] ss:$9 sm:$0xff] %v1297_v49  ;;  %v1008_v49 = vand.u32 65535, %v2899_v12 }
 0x544   : > { %1578 = vst [vmem:[#allocation1 + $0x5] ss:$9 sm:$0xff] %v1298_v36 }
 0x545   : > { %1579 = vst [vmem:[#allocation1 + $0x6] ss:$9 sm:$0xff] %v1299_v30 }
 0x546   : > { %1580 = vst [vmem:[#allocation1 + $0x7] ss:$9 sm:$0xff] %v1300_v15 }
 0x54d   : > { %v2931_v26 = vld [vmem:[#allocation1] sm:$0xff] }
 0x54e   : > { %1582 = vst [vmem:[#allocation1] ss:$9 sm:$0xff] %v1301_v18 }
 0x54f   : > { %1583 = vst [vmem:[#allocation1 + $0x1] ss:$9 sm:$0xff] %v1302_v56  ;;  %v1010_v56 = vcvt.s32.f32 %v1008_v49 }
 0x550   : > { %1584 = vst [vmem:[#allocation1 + $0x2] ss:$9 sm:$0xff] %v1303_v58  ;;  %v1002_v58 = vpop.xlane.xlu0 %1001 }
 0x551   : > { %1585 = vst [vmem:[#allocation1 + $0x3] ss:$9 sm:$0xff] %v1304_v44  ;;  %v1003_v45 = vcvt.f32.s32 %v1002_v58 }
 0x552   : > { %1586 = vst [vmem:[#allocation1 + $0x4] ss:$9 sm:$0xff] %v1305_v23 }
 0x553   : > { %1587 = vst [vmem:[#allocation1 + $0x5] ss:$9 sm:$0xff] %v1306_v38  ;;  %v1039_v38 = vshra.s32 %v2946_v35, 16 }
 0x554   : > { %1588 = vst [vmem:[#allocation1 + $0x6] ss:$9 sm:$0xff] %v1307_v33  ;;  %v1005_v33 = vshll.u32 %v1004_v0, 16 }
 0x555   : > { %1589 = vst [vmem:[#allocation1 + $0x7] ss:$9 sm:$0xff] %v1308_v54  ;;  %v1041_v54 = vcvt.s32.f32 %v1039_v38 }
 0x556   : > { %v1006_v13 = vadd.s32 %v1005_v33, %v1003_v45  ;;  %v1040_v45 = vcvt.s32.f32 %v1038_v48 }
 0x558   : > { %v1325_v46 = vperm.slane %v1006_v13, 0  ;;  %v1331_v34 = vperm.slane %v1006_v13, 6 }
 0x55c   : > { %v2935_v37 = vld [vmem:[#allocation1] sm:$0xff] }
 0x55d   : > { %1591 = vst [vmem:[#allocation1] ss:$9 sm:$0xff] %v1309_v8  ;;  %v1326_v8 = vperm.slane %v1006_v13, 1 }
 0x55e   : > { %1592 = vst [vmem:[#allocation1 + $0x1] ss:$9 sm:$0xff] %v1310_v5 }
 0x55f   : > { %1593 = vst [vmem:[#allocation1 + $0x2] ss:$9 sm:$0xff] %v1311_v17  ;;  %v1327_v17 = vperm.slane %v1006_v13, 2 }
 0x560   : > { %1594 = vst [vmem:[#allocation1 + $0x3] ss:$9 sm:$0xff] %v1312_v41 }
 0x561   : > { %1595 = vst [vmem:[#allocation1 + $0x4] ss:$9 sm:$0xff] %v1313_v28  ;;  %v1328_v28 = vperm.slane %v1006_v13, 3 }
 0x562   : > { %1596 = vst [vmem:[#allocation1 + $0x5] ss:$9 sm:$0xff] %v1314_v62  ;;  %v1329_v62 = vperm.slane %v1006_v13, 4 }
 0x563   : > { %1597 = vst [vmem:[#allocation1 + $0x6] ss:$9 sm:$0xff] %v1315_v7  ;;  %v1330_v7 = vperm.slane %v1006_v13, 5 }
 0x564   : > { %1598 = vst [vmem:[#allocation1 + $0x7] ss:$9 sm:$0xff] %v1316_v63 }
 0x56b   : > { %v2941_v15 = vld [vmem:[#allocation1] sm:$0xff] }
 0x598   : > { %v987_v39 = vpop.xlane.xlu1 %986 }
 0x599   : > { %v988_v21 = vcvt.f32.s32 %v987_v39  ;;  %v1332_v39 = vperm.slane %v1006_v13, 7 }
 0x59b   : > { %v991_v55 = vadd.s32 %v990_v14, %v988_v21 }
 0x59d   : > { %v1317_v36 = vperm.slane %v991_v55, 0  ;;  %v1318_v59 = vperm.slane %v991_v55, 1  ;;  %v1319_v30 = vperm.slane %v991_v55, 2  ;;  %v1320_v4 = vperm.slane %v991_v55, 3 }
 0x59e   : > { %v1321_v43 = vperm.slane %v991_v55, 4  ;;  %v1322_v50 = vperm.slane %v991_v55, 5  ;;  %v1323_v44 = vperm.slane %v991_v55, 6  ;;  %v1324_v12 = vperm.slane %v991_v55, 7 }
 0x59f   : > { %1600 = vst [vmem:[#allocation1] ss:$9 sm:$0xff] %v1317_v36 }
 0x5a0   : > { %1601 = vst [vmem:[#allocation1 + $0x1] ss:$9 sm:$0xff] %v1318_v59  ;;  %v1013_v18 = vpop.xlane.xlu1 %1012 }
 0x5a1   : > { %1602 = vst [vmem:[#allocation1 + $0x2] ss:$9 sm:$0xff] %v1319_v30  ;;  %vm1014_vm5 = vcmp.eq.f32.partialorder %v2906_v40, %v1013_v18  ;;  %v3196_v40 = vld [vmem:[#allocation6_spill] sm:$0xff]  ;;  %v1019_v55 = vcvt.f32.s32 %v1013_v18  ;;  %v3197_v30 = vld [vmem:[#allocation11_spill] sm:$0xff] }
 0x5a2   : > { %1603 = vst [vmem:[#allocation1 + $0x3] ss:$9 sm:$0xff] %v1320_v4  ;;  %v1015_v23 = vsel %vm1014_vm5, %v1010_v56, inf  ;;  %vm640_vm6 = vcmp.eq.f32.partialorder %v3196_v40, %v2584_v53  ;;  %v1055_v53 = vcvt.s32.f32 %v1053_v2  ;;  %v3198_v4 = vld [vmem:[#allocation5_spill] sm:$0xff]  ;;  %vm1807_vm5 = vcmask 130112  }
 0x5a3   : > { %1604 = vst [vmem:[#allocation1 + $0x4] ss:$9 sm:$0xff] %v1321_v43  ;;  %1016 = vmin.xlane.f32.xlu2 %v1015_v23  ;;  %v672_v41 = vsel %vm640_vm6, %v2500_v52, 16  ;;  %v1020_v49 = vshll.u32 %v1019_v55, 16  ;;  %vm639_vm8 = vcmp.eq.f32.partialorder %v3198_v4, %v3197_v30  ;;  %vm1811_vm6 = vcmask 195712  }
 0x5a4   : > { %1605 = vst [vmem:[#allocation1 + $0x5] ss:$9 sm:$0xff] %v1322_v50  ;;  %v1082_v63 = vsel %vm514_vm1, %v672_v41, 2147483647  ;;  %v671_v0 = vsel %vm639_vm8, %v2500_v52, 16  ;;  %vm1819_vm8 = vcmask 326912  }
 0x5a5   : > { %1606 = vst [vmem:[#allocation1 + $0x6] ss:$9 sm:$0xff] %v1323_v44  ;;  %v1084_v14 = vshra.s32 %v1082_v63, 16  ;;  %v1067_v33 = vsel %vm514_vm1, %v671_v0, 2147483647  ;;  %v1083_v41 = vand.u32 65535, %v1082_v63 }
 0x5a6   : > { %1607 = vst [vmem:[#allocation1 + $0x7] ss:$9 sm:$0xff] %v1324_v12  ;;  %v1069_v40 = vshra.s32 %v1067_v33, 16  ;;  %v1068_v30 = vand.u32 65535, %v1067_v33 }
 0x5a7   : > { %v1086_v21 = vcvt.s32.f32 %v1084_v14 }
 0x5a8   : > { %v2952_v31 = vpop.xlane.xlu1 %1057  ;;  %v1071_v2 = vcvt.s32.f32 %v1069_v40  ;;  %v1070_v48 = vcvt.s32.f32 %v1068_v30 }
 0x5a9   : > { %vm1059_vm7 = vcmp.eq.f32.partialorder %v2924_v9, %v2952_v31 }
 0x5aa   : > { %v1060_v60 = vsel %vm1059_vm7, %v1055_v53, inf  ;;  %vm1815_vm7 = vcmask 261312  }
 0x5ab   : > { %1042 = vmin.xlane.f32.xlu2 %v1041_v54 }
 0x5ad   : > { %v2955_v5 = vld [vmem:[#allocation1] sm:$0xff] }
 0x5ae   : > { %1609 = vst [vmem:[#allocation1] ss:$9 sm:$0xff] %v1325_v46 }
 0x5af   : > { %1610 = vst [vmem:[#allocation1 + $0x1] ss:$9 sm:$0xff] %v1326_v8  ;;  %v3199_v8 = vld [vmem:[#allocation13_spill] sm:$0xff] }
 0x5b0   : > { %1611 = vst [vmem:[#allocation1 + $0x2] ss:$9 sm:$0xff] %v1327_v17  ;;  %v3200_v17 = vld [vmem:[#allocation8_spill] sm:$0xff] }
 0x5b1   : > { %1612 = vst [vmem:[#allocation1 + $0x3] ss:$9 sm:$0xff] %v1328_v28  ;;  %vm642_vm10 = vcmp.eq.f32.partialorder %v3200_v17, %v3199_v8  ;;  %v1023_v17 = vand.u32 65535, %v2882_v3 }
 0x5b2   : > { %1613 = vst [vmem:[#allocation1 + $0x4] ss:$9 sm:$0xff] %v1329_v62  ;;  %v1085_v62 = vcvt.s32.f32 %v1083_v41 }
 0x5b3   : > { %1614 = vst [vmem:[#allocation1 + $0x5] ss:$9 sm:$0xff] %v1330_v7  ;;  %1061 = vmin.xlane.f32.xlu2 %v1060_v60  ;;  %v1025_v41 = vcvt.s32.f32 %v1023_v17  ;;  %v1064_v17 = vcvt.f32.s32 %v2952_v31 }
 0x5b4   : > { %1615 = vst [vmem:[#allocation1 + $0x6] ss:$9 sm:$0xff] %v1331_v34 }
 0x5b5   : > { %1616 = vst [vmem:[#allocation1 + $0x7] ss:$9 sm:$0xff] %v1332_v39  ;;  %v2977_v39 = vpop.xlane.xlu0 %1027 }
 0x5b6   : > { %vm1029_vm0 = vcmp.eq.f32.partialorder %v2885_v6, %v2977_v39 }
 0x5bb   : > { %1087 = vmin.xlane.f32.xlu2 %v1086_v21 }
 0x5bc   : > { %v2964_v58 = vld [vmem:[#allocation1] sm:$0xff] }
 0x616   : > { %v1017_v9 = vpop.xlane.xlu2 %1016 }
 0x617   : > { %v1018_v36 = vcvt.f32.s32 %v1017_v9 }
 0x619   : > { %v1021_v59 = vadd.s32 %v1020_v49, %v1018_v36  ;;  %v3201_v36 = vld [vmem:[#allocation12_spill] sm:$0xff] }
 0x61b   : > { %v1333_v43 = vperm.slane %v1021_v59, 0  ;;  %v1334_v50 = vperm.slane %v1021_v59, 1  ;;  %v1335_v56 = vperm.slane %v1021_v59, 2  ;;  %v1336_v44 = vperm.slane %v1021_v59, 3 }
 0x61c   : > { %v1337_v12 = vperm.slane %v1021_v59, 4  ;;  %v1338_v18 = vperm.slane %v1021_v59, 5  ;;  %v1339_v38 = vperm.slane %v1021_v59, 6  ;;  %v1340_v35 = vperm.slane %v1021_v59, 7  ;;  %v3202_v59 = vld [vmem:[#allocation7_spill] sm:$0xff] }
 0x61d   : > { %1618 = vst [vmem:[#allocation1] ss:$9 sm:$0xff] %v1333_v43  ;;  %vm641_vm12 = vcmp.eq.f32.partialorder %v3202_v59, %v3201_v36  ;;  %v1034_v59 = vcvt.f32.s32 %v2977_v39 }
 0x61e   : > { %1619 = vst [vmem:[#allocation1 + $0x1] ss:$9 sm:$0xff] %v1334_v50  ;;  %v1043_v23 = vpop.xlane.xlu2 %1042 }
 0x61f   : > { %1620 = vst [vmem:[#allocation1 + $0x2] ss:$9 sm:$0xff] %v1335_v56  ;;  %vm1044_vm9 = vcmp.eq.f32.partialorder %v1041_v54, %v1043_v23  ;;  %v674_v54 = vsel %vm642_vm10, %v2500_v52, 16  ;;  %v1049_v14 = vcvt.f32.s32 %v1043_v23  ;;  %v2218_v56 = vmov 0   ;;  %v3204_v23 = vld [vmem:[#allocation10_spill] sm:$0xff] }
 0x620   : > { %1621 = vst [vmem:[#allocation1 + $0x3] ss:$9 sm:$0xff] %v1336_v44  ;;  %v1045_v13 = vsel %vm1044_vm9, %v1040_v45, inf  ;;  %v1112_v53 = vsel %vm514_vm1, %v674_v54, 2147483647  ;;  %2151 = vset.pattern.permute.xlu1 %v2218_v56  ;;  %2152 = vset.pattern.permute.xlu2 %v2218_v56  ;;  %v1030_v54 = vsel %vm1029_vm0, %v1025_v41, inf }
 0x621   : > { %1622 = vst [vmem:[#allocation1 + $0x4] ss:$9 sm:$0xff] %v1337_v12  ;;  %1046 = vmin.xlane.f32.xlu0 %v1045_v13  ;;  %v1114_v34 = vshra.s32 %v1112_v53, 16  ;;  %v1050_v9 = vshll.u32 %v1049_v14, 16  ;;  %v1113_v45 = vand.u32 65535, %v1112_v53  ;;  %vm1823_vm9 = vcmask 392512  }
 0x622   : > { %1623 = vst [vmem:[#allocation1 + $0x5] ss:$9 sm:$0xff] %v1338_v18  ;;  %2150 = vset.pattern.permute.xlu0 %v2218_v56  ;;  %v3203_v18 = vld [vmem:[#allocation15_spill] sm:$0xff]  ;;  %vm1827_vm10 = vcmask 458112   ;;  %vm1851_vm0 = vcmask 851712  }
 0x623   : > { %1624 = vst [vmem:[#allocation1 + $0x6] ss:$9 sm:$0xff] %v1339_v38  ;;  %v1116_v60 = vcvt.s32.f32 %v1114_v34  ;;  %vm644_vm14 = vcmp.eq.f32.partialorder %v3204_v23, %v3203_v18 }
 0x624   : > { %1625 = vst [vmem:[#allocation1 + $0x7] ss:$9 sm:$0xff] %v1340_v35  ;;  %v676_v38 = vsel %vm644_vm14, %v2500_v52, 16  ;;  %v1115_v35 = vcvt.s32.f32 %v1113_v45  ;;  %vm1843_vm14 = vcmask 720512  }
 0x625   : > { %v1142_v13 = vsel %vm514_vm1, %v676_v38, 2147483647 }
 0x626   : > { %v2968_v46 = vpop.xlane.xlu2 %1061 }
 0x629   : > { %1072 = vmin.xlane.f32.xlu0 %v1071_v2 }
 0x62e   : > { %v2973_v28 = vpop.xlane.xlu2 %1087 }
 0x62f   : > { %vm1089_vm11 = vcmp.eq.f32.partialorder %v1086_v21, %v2973_v28  ;;  %v673_v21 = vsel %vm641_vm12, %v2500_v52, 16  ;;  %vm1835_vm12 = vcmask 589312  }
 0x630   : > { %v1090_v7 = vsel %vm1089_vm11, %v1085_v62, inf  ;;  %v1097_v43 = vsel %vm514_vm1, %v673_v21, 2147483647  ;;  %v1035_v21 = vshll.u32 %v1034_v59, 16  ;;  %vm1831_vm11 = vcmask 523712  }
 0x631   : > { %1091 = vmin.xlane.f32.xlu0 %v1090_v7  ;;  %v1099_v44 = vshra.s32 %v1097_v43, 16 }
 0x633   : > { %v1101_v12 = vcvt.s32.f32 %v1099_v44  ;;  %v3026_v44 = vld [vmem:[#allocation1] sm:$0xff] }
 0x639   : > { %1117 = vmin.xlane.f32.xlu0 %v1116_v60 }
 0x694   : > { %v1047_v55 = vpop.xlane.xlu0 %1046 }
 0x695   : > { %v1048_v63 = vcvt.f32.s32 %v1047_v55  ;;  %v1143_v55 = vand.u32 65535, %v1142_v13 }
 0x697   : > { %v2979_v49 = vadd.s32 %v1050_v9, %v1048_v63  ;;  %v1145_v63 = vcvt.s32.f32 %v1143_v55 }
 0x699   : > { %v1349_v39 = vperm.slane %v2979_v49, 0  ;;  %v1354_v41 = vperm.slane %v2979_v49, 5 }
 0x69c   : > { %v1073_v4 = vpop.xlane.xlu0 %1072 }
 0x69d   : > { %vm1074_vm13 = vcmp.eq.f32.partialorder %v1071_v2, %v1073_v4  ;;  %v1144_v2 = vshra.s32 %v1142_v13, 16  ;;  %v1079_v3 = vcvt.f32.s32 %v1073_v4 }
 0x69e   : > { %v1075_v50 = vsel %vm1074_vm13, %v1070_v48, inf  ;;  %vm1839_vm13 = vcmask 654912  }
 0x69f   : > { %1076 = vmin.xlane.f32.xlu1 %v1075_v50  ;;  %v1146_v8 = vcvt.s32.f32 %v1144_v2  ;;  %v1080_v62 = vshll.u32 %v1079_v3, 16  ;;  %v1352_v2 = vperm.slane %v2979_v49, 3  ;;  %v1356_v3 = vperm.slane %v2979_v49, 7 }
 0x6a4   : > { %v2985_v0 = vpop.xlane.xlu0 %1091 }
 0x6a7   : > { %1102 = vmin.xlane.f32.xlu1 %v1101_v12 }
 0x6ac   : > { %v2990_v33 = vpop.xlane.xlu0 %1117 }
 0x6ad   : > { %vm1119_vm15 = vcmp.eq.f32.partialorder %v1116_v60, %v2990_v33 }
 0x6ae   : > { %v1120_v40 = vsel %vm1119_vm15, %v1115_v35, inf  ;;  %v1350_v35 = vperm.slane %v2979_v49, 1  ;;  %vm1847_vm15 = vcmask 786112  }
 0x6af   : > { %1121 = vmin.xlane.f32.xlu1 %v1120_v40  ;;  %v1351_v40 = vperm.slane %v2979_v49, 2 }
 0x6b7   : > { %1147 = vmin.xlane.f32.xlu1 %v1146_v8 }
 0x6bf   : > { %1031 = vmin.xlane.f32.xlu1 %v1030_v54  ;;  %v1063_v54 = vcvt.f32.s32 %v2968_v46 }
 0x6d8   : > { %1712 = vperm.xlu1 %2151, %v2702_v20   ;;  %v3205_v20 = vld [vmem:[#allocation14_spill] sm:$0xff] }
 0x6e0   : > { %1721 = vperm.xlu1 %2151, %v2726_v22   ;;  %v3206_v22 = vld [vmem:[#allocation9_spill] sm:$0xff] }
 0x6e1   : > { %vm643_vm2 = vcmp.eq.f32.partialorder %v3206_v22, %v3205_v20 }
 0x6e8   : > { %1727 = vperm.xlu1 %2151, %v2757_v32   ;;  %v1098_v32 = vand.u32 65535, %v1097_v43 }
 0x6f0   : > { %1736 = vperm.xlu1 %2151, %v2820_v25   ;;  %v675_v25 = vsel %vm643_vm2, %v2500_v52, 16  ;;  %vm1855_vm2 = vcmask 917312  }
 0x6f8   : > { %1745 = vperm.xlu1 %2151, %v2841_v19   ;;  %v1100_v19 = vcvt.s32.f32 %v1098_v32 }
 0x700   : > { %1754 = vperm.xlu1 %2151, %v2912_v16   ;;  %v3014_v16 = vsel %vm514_vm1, %v675_v25, 2147483647 }
 0x708   : > { %1763 = vperm.xlu1 %2151, %v2935_v37  }
 0x710   : > { %1772 = vperm.xlu1 %2151, %v2964_v58   ;;  %v1129_v58 = vshra.s32 %v3014_v16, 16 }
 0x712   : > { %v1077_v6 = vpop.xlane.xlu1 %1076  ;;  %v3019_v14 = vcvt.s32.f32 %v1129_v58 }
 0x713   : > { %v1078_v53 = vcvt.f32.s32 %v1077_v6  ;;  %v1065_v6 = vshll.u32 %v1064_v17, 16 }
 0x715   : > { %v3005_v7 = vadd.s32 %v1080_v62, %v1078_v53  ;;  %v1066_v62 = vadd.s32 %v1065_v6, %v1063_v54 }
 0x717   : > { %v1357_v53 = vperm.slane %v1066_v62, 0  ;;  %v1358_v31 = vperm.slane %v1066_v62, 1  ;;  %v1359_v22 = vperm.slane %v1066_v62, 2  ;;  %v1360_v32 = vperm.slane %v1066_v62, 3 }
 0x718   : > { %v1361_v46 = vperm.slane %v1066_v62, 4  ;;  %v1363_v25 = vperm.slane %v1066_v62, 6  ;;  %v1367_v58 = vperm.slane %v3005_v7, 2  ;;  %v1368_v55 = vperm.slane %v3005_v7, 3 }
 0x719   : > { %v1371_v59 = vperm.slane %v3005_v7, 6 }
 0x71a   : > { %v3010_v34 = vpop.xlane.xlu1 %1102 }
 0x71b   : > { %vm1104_vm3 = vcmp.eq.f32.partialorder %v1101_v12, %v3010_v34 }
 0x71c   : > { %v1105_v37 = vsel %vm1104_vm3, %v1100_v19, inf  ;;  %v1366_v19 = vperm.slane %v3005_v7, 1  ;;  %vm1859_vm3 = vcmask 982912  }
 0x71d   : > { %1106 = vmin.xlane.f32.xlu2 %v1105_v37 }
 0x722   : > { %v3017_v60 = vpop.xlane.xlu1 %1121 }
 0x725   : > { %1132 = vmin.xlane.f32.xlu2 %v3019_v14 }
 0x72a   : > { %v3022_v9 = vpop.xlane.xlu1 %1147 }
 0x72b   : > { %vm1149_vm4 = vcmp.eq.f32.partialorder %v1146_v8, %v3022_v9  ;;  %v1353_v8 = vperm.slane %v2979_v49, 4 }
 0x72c   : > { %v1150_v36 = vsel %vm1149_vm4, %v1145_v63, inf  ;;  %v1369_v63 = vperm.slane %v3005_v7, 4  ;;  %vm1863_vm4 = vcmask 1048512  }
 0x72d   : > { %1151 = vmin.xlane.f32.xlu2 %v1150_v36  ;;  %v1370_v36 = vperm.slane %v3005_v7, 5 }
 0x732   : > { %v1032_v30 = vpop.xlane.xlu1 %1031 }
 0x733   : > { %v1033_v4 = vcvt.f32.s32 %v1032_v30  ;;  %v1093_v30 = vcvt.f32.s32 %v2985_v0 }
 0x735   : > { %v1036_v48 = vadd.s32 %v1035_v21, %v1033_v4 }
 0x737   : > { %v1341_v43 = vperm.slane %v1036_v48, 0  ;;  %v1342_v50 = vperm.slane %v1036_v48, 1  ;;  %v1343_v56 = vperm.slane %v1036_v48, 2  ;;  %v1344_v12 = vperm.slane %v1036_v48, 3 }
 0x738   : > { %v1345_v18 = vperm.slane %v1036_v48, 4  ;;  %v1346_v23 = vperm.slane %v1036_v48, 5  ;;  %v1347_v45 = vperm.slane %v1036_v48, 6  ;;  %v1348_v38 = vperm.slane %v1036_v48, 7 }
 0x739   : > { %1627 = vst [vmem:[#allocation1] ss:$9 sm:$0xff] %v1341_v43 }
 0x73a   : > { %1628 = vst [vmem:[#allocation1 + $0x1] ss:$9 sm:$0xff] %v1342_v50 }
 0x73b   : > { %1629 = vst [vmem:[#allocation1 + $0x2] ss:$9 sm:$0xff] %v1343_v56 }
 0x73c   : > { %1630 = vst [vmem:[#allocation1 + $0x3] ss:$9 sm:$0xff] %v1344_v12 }
 0x73d   : > { %1631 = vst [vmem:[#allocation1 + $0x4] ss:$9 sm:$0xff] %v1345_v18 }
 0x73e   : > { %1632 = vst [vmem:[#allocation1 + $0x5] ss:$9 sm:$0xff] %v1346_v23 }
 0x73f   : > { %1633 = vst [vmem:[#allocation1 + $0x6] ss:$9 sm:$0xff] %v1347_v45 }
 0x740   : > { %1634 = vst [vmem:[#allocation1 + $0x7] ss:$9 sm:$0xff] %v1348_v38 }
 0x745   : > { %1715 = vperm.xlu2 %2152, %v2715_v11   ;;  %v1355_v11 = vperm.slane %v2979_v49, 6  ;;  %v1362_v49 = vperm.slane %v1066_v62, 5 }
 0x747   : > { %v3031_v13 = vld [vmem:[#allocation1] sm:$0xff] }
 0x748   : > { %1636 = vst [vmem:[#allocation1] ss:$9 sm:$0xff] %v1349_v39 }
 0x749   : > { %1637 = vst [vmem:[#allocation1 + $0x1] ss:$9 sm:$0xff] %v1350_v35  ;;  %v1128_v35 = vand.u32 65535, %v3014_v16  ;;  %v1123_v16 = vcvt.f32.s32 %v3017_v60 }
 0x74a   : > { %1638 = vst [vmem:[#allocation1 + $0x2] ss:$9 sm:$0xff] %v1351_v40 }
 0x74b   : > { %1639 = vst [vmem:[#allocation1 + $0x3] ss:$9 sm:$0xff] %v1352_v2  ;;  %v1130_v54 = vcvt.s32.f32 %v1128_v35 }
 0x74c   : > { %1640 = vst [vmem:[#allocation1 + $0x4] ss:$9 sm:$0xff] %v1353_v8 }
 0x74d   : > { %1641 = vst [vmem:[#allocation1 + $0x5] ss:$9 sm:$0xff] %v1354_v41  ;;  %1718 = vperm.xlu2 %2152, %v2718_v1   ;;  %v1364_v1 = vperm.slane %v1066_v62, 7 }
 0x74e   : > { %1642 = vst [vmem:[#allocation1 + $0x6] ss:$9 sm:$0xff] %v1355_v11 }
 0x74f   : > { %1643 = vst [vmem:[#allocation1 + $0x7] ss:$9 sm:$0xff] %v1356_v3 }
 0x755   : > { %1724 = vperm.xlu2 %2152, %v2746_v29   ;;  %v1365_v29 = vperm.slane %v3005_v7, 0 }
 0x756   : > { %v1644_v20 = vld [vmem:[#allocation1] sm:$0xff] }
 0x757   : > { %1645 = vst [vmem:[#allocation1] ss:$9 sm:$0xff] %v1357_v53  ;;  %1781 = vperm.xlu1 %2151, %v1644_v20  }
 0x758   : > { %1646 = vst [vmem:[#allocation1 + $0x1] ss:$9 sm:$0xff] %v1358_v31 }
 0x759   : > { %1647 = vst [vmem:[#allocation1 + $0x2] ss:$9 sm:$0xff] %v1359_v22 }
 0x75a   : > { %1648 = vst [vmem:[#allocation1 + $0x3] ss:$9 sm:$0xff] %v1360_v32 }
 0x75b   : > { %1649 = vst [vmem:[#allocation1 + $0x4] ss:$9 sm:$0xff] %v1361_v46 }
 0x75c   : > { %1650 = vst [vmem:[#allocation1 + $0x5] ss:$9 sm:$0xff] %v1362_v49 }
 0x75d   : > { %1651 = vst [vmem:[#allocation1 + $0x6] ss:$9 sm:$0xff] %v1363_v25  ;;  %1733 = vperm.xlu2 %2152, %v2810_v51   ;;  %v1094_v51 = vcvt.f32.s32 %v2973_v28 }
 0x75e   : > { %1652 = vst [vmem:[#allocation1 + $0x7] ss:$9 sm:$0xff] %v1364_v1 }
 0x75f   : > { %v1095_v21 = vshll.u32 %v1094_v51, 16 }
 0x761   : > { %v1096_v4 = vadd.s32 %v1095_v21, %v1093_v30  ;;  %v3076_v21 = vadd.s32 4294967288, %v2500_v52 }
 0x763   : > { %v1373_v48 = vperm.slane %v1096_v4, 0  ;;  %v1374_v43 = vperm.slane %v1096_v4, 1  ;;  %v1375_v50 = vperm.slane %v1096_v4, 2  ;;  %v1376_v56 = vperm.slane %v1096_v4, 3 }
 0x764   : > { %v1377_v12 = vperm.slane %v1096_v4, 4  ;;  %v1378_v0 = vperm.slane %v1096_v4, 5  ;;  %v1380_v18 = vperm.slane %v1096_v4, 7 }
 0x765   : > { %v3046_v37 = vld [vmem:[#allocation1] sm:$0xff]  ;;  %1742 = vperm.xlu2 %2152, %v2830_v61   ;;  %v1372_v61 = vperm.slane %v3005_v7, 7  ;;  %v1379_v7 = vperm.slane %v1096_v4, 6 }
 0x766   : > { %1654 = vst [vmem:[#allocation1] ss:$9 sm:$0xff] %v1365_v29 }
 0x767   : > { %1655 = vst [vmem:[#allocation1 + $0x1] ss:$9 sm:$0xff] %v1366_v19 }
 0x768   : > { %1656 = vst [vmem:[#allocation1 + $0x2] ss:$9 sm:$0xff] %v1367_v58 }
 0x769   : > { %1657 = vst [vmem:[#allocation1 + $0x3] ss:$9 sm:$0xff] %v1368_v55 }
 0x76a   : > { %1658 = vst [vmem:[#allocation1 + $0x4] ss:$9 sm:$0xff] %v1369_v63 }
 0x76b   : > { %1659 = vst [vmem:[#allocation1 + $0x5] ss:$9 sm:$0xff] %v1370_v36 }
 0x76c   : > { %1660 = vst [vmem:[#allocation1 + $0x6] ss:$9 sm:$0xff] %v1371_v59 }
 0x76d   : > { %1661 = vst [vmem:[#allocation1 + $0x7] ss:$9 sm:$0xff] %v1372_v61  ;;  %1751 = vperm.xlu2 %2152, %v2890_v47  }
 0x774   : > { %v1662_v28 = vld [vmem:[#allocation1] sm:$0xff] }
 0x775   : > { %1663 = vst [vmem:[#allocation1] ss:$9 sm:$0xff] %v1373_v48  ;;  %1760 = vperm.xlu2 %2152, %v2931_v26   ;;  %v1109_v26 = vcvt.f32.s32 %v3010_v34  ;;  %v1124_v34 = vcvt.f32.s32 %v2990_v33  ;;  %v3079_v48 = vadd.s32 4294967272, %v2500_v52 }
 0x776   : > { %1664 = vst [vmem:[#allocation1 + $0x1] ss:$9 sm:$0xff] %v1374_v43  ;;  %v3082_v43 = vadd.s32 4294967264, %v2500_v52 }
 0x777   : > { %1665 = vst [vmem:[#allocation1 + $0x2] ss:$9 sm:$0xff] %v1375_v50  ;;  %v1110_v45 = vshll.u32 %v1109_v26, 16  ;;  %v1125_v62 = vshll.u32 %v1124_v34, 16 }
 0x778   : > { %1666 = vst [vmem:[#allocation1 + $0x3] ss:$9 sm:$0xff] %v1376_v56 }
 0x779   : > { %1667 = vst [vmem:[#allocation1 + $0x4] ss:$9 sm:$0xff] %v1377_v12  ;;  %v1126_v53 = vadd.s32 %v1125_v62, %v1123_v16 }
 0x77a   : > { %1668 = vst [vmem:[#allocation1 + $0x5] ss:$9 sm:$0xff] %v1378_v0 }
 0x77b   : > { %1669 = vst [vmem:[#allocation1 + $0x6] ss:$9 sm:$0xff] %v1379_v7  ;;  %v1389_v31 = vperm.slane %v1126_v53, 0  ;;  %v1390_v20 = vperm.slane %v1126_v53, 1  ;;  %v1391_v32 = vperm.slane %v1126_v53, 2  ;;  %v1393_v33 = vperm.slane %v1126_v53, 4 }
 0x77c   : > { %1670 = vst [vmem:[#allocation1 + $0x7] ss:$9 sm:$0xff] %v1380_v18  ;;  %v1394_v46 = vperm.slane %v1126_v53, 5  ;;  %v1395_v49 = vperm.slane %v1126_v53, 6  ;;  %v1396_v25 = vperm.slane %v1126_v53, 7 }
 0x77d   : > { %1769 = vperm.xlu2 %2152, %v2955_v5  }
 0x783   : > { %v1671_v47 = vld [vmem:[#allocation1] sm:$0xff] }
 0x784   : > { %1790 = vperm.xlu1 %2151, %v1671_v47  }
 0x785   : > { %1778 = vperm.xlu2 %2152, %v3031_v13  }
 0x78d   : > { %1787 = vperm.xlu2 %2152, %v1662_v28  }
 0x790   : > { %v1107_v23 = vpop.xlane.xlu2 %1106 }
 0x791   : > { %v1108_v38 = vcvt.f32.s32 %v1107_v23 }
 0x793   : > { %v1111_v39 = vadd.s32 %v1110_v45, %v1108_v38 }
 0x795   : > { %v1381_v40 = vperm.slane %v1111_v39, 0  ;;  %v1382_v2 = vperm.slane %v1111_v39, 1  ;;  %v1383_v8 = vperm.slane %v1111_v39, 2  ;;  %v1384_v17 = vperm.slane %v1111_v39, 3 }
 0x796   : > { %v1385_v41 = vperm.slane %v1111_v39, 4  ;;  %v1386_v5 = vperm.slane %v1111_v39, 5  ;;  %v1387_v13 = vperm.slane %v1111_v39, 6  ;;  %v1388_v3 = vperm.slane %v1111_v39, 7 }
 0x797   : > { %1672 = vst [vmem:[#allocation1] ss:$9 sm:$0xff] %v1381_v40 }
 0x798   : > { %1673 = vst [vmem:[#allocation1 + $0x1] ss:$9 sm:$0xff] %v1382_v2  ;;  %v1133_v11 = vpop.xlane.xlu2 %1132 }
 0x799   : > { %1674 = vst [vmem:[#allocation1 + $0x2] ss:$9 sm:$0xff] %v1383_v8  ;;  %vm1134_vm1 = vcmp.eq.f32.partialorder %v3019_v14, %v1133_v11  ;;  %v1392_v14 = vperm.slane %v1126_v53, 3  ;;  %v1139_v1 = vcvt.f32.s32 %v1133_v11 }
 0x79a   : > { %1675 = vst [vmem:[#allocation1 + $0x3] ss:$9 sm:$0xff] %v1384_v17  ;;  %v1135_v6 = vsel %vm1134_vm1, %v1130_v54, inf  ;;  %vm1897_vm1 = vcmask 1040384  }
 0x79b   : > { %1676 = vst [vmem:[#allocation1 + $0x4] ss:$9 sm:$0xff] %v1385_v41  ;;  %1136 = vmin.xlane.f32.xlu0 %v1135_v6  ;;  %v1140_v19 = vshll.u32 %v1139_v1, 16 }
 0x79c   : > { %1677 = vst [vmem:[#allocation1 + $0x5] ss:$9 sm:$0xff] %v1386_v5 }
 0x79d   : > { %1678 = vst [vmem:[#allocation1 + $0x6] ss:$9 sm:$0xff] %v1387_v13 }
 0x79e   : > { %1679 = vst [vmem:[#allocation1 + $0x7] ss:$9 sm:$0xff] %v1388_v3 }
 0x7a0   : > { %v1152_v29 = vpop.xlane.xlu2 %1151 }
 0x7a1   : > { %v1153_v30 = vcvt.f32.s32 %v1152_v29 }
 0x7a5   : > { %v1680_v22 = vld [vmem:[#allocation1] sm:$0xff] }
 0x7a6   : > { %1681 = vst [vmem:[#allocation1] ss:$9 sm:$0xff] %v1389_v31 }
 0x7a7   : > { %1682 = vst [vmem:[#allocation1 + $0x1] ss:$9 sm:$0xff] %v1390_v20 }
 0x7a8   : > { %1683 = vst [vmem:[#allocation1 + $0x2] ss:$9 sm:$0xff] %v1391_v32 }
 0x7a9   : > { %1684 = vst [vmem:[#allocation1 + $0x3] ss:$9 sm:$0xff] %v1392_v14 }
 0x7aa   : > { %1685 = vst [vmem:[#allocation1 + $0x4] ss:$9 sm:$0xff] %v1393_v33 }
 0x7ab   : > { %1686 = vst [vmem:[#allocation1 + $0x5] ss:$9 sm:$0xff] %v1394_v46 }
 0x7ac   : > { %1687 = vst [vmem:[#allocation1 + $0x6] ss:$9 sm:$0xff] %v1395_v49 }
 0x7ad   : > { %1688 = vst [vmem:[#allocation1 + $0x7] ss:$9 sm:$0xff] %v1396_v25 }
 0x7af   : > { %1709 = vperm.xlu0 %2150, %v2679_v10  }
 0x7b4   : > { %v1689_v60 = vld [vmem:[#allocation1] sm:$0xff] }
 0x7b5   : > { %1796 = vperm.xlu2 %2152, %v1689_v60  }
 0x7b7   : > { %1730 = vperm.xlu0 %2150, %v2786_v42  }
 0x7bf   : > { %1739 = vperm.xlu0 %2150, %v2824_v27  }
 0x7c7   : > { %1748 = vperm.xlu0 %2150, %v2849_v57  }
 0x7cf   : > { %1757 = vperm.xlu0 %2150, %v2927_v24  }
 0x7d7   : > { %1766 = vperm.xlu0 %2150, %v2941_v15   ;;  %v1716_v15 = vpop.permute.xlu2 %1715 }
 0x7df   : > { %1775 = vperm.xlu0 %2150, %v3026_v44   ;;  %v1154_v44 = vcvt.f32.s32 %v3022_v9  ;;  %v1809_v9 = vadd.s32 4294967280, %v2500_v52  ;;  %v1719_v28 = vpop.permute.xlu2 %1718 }
 0x7e0   : > { %v1814_v45 = vperm.slane %v1719_v28, %v3079_v48  ;;  %v1833_v28 = vadd.s32 4294967232, %v2500_v52 }
 0x7e1   : > { %v1155_v61 = vshll.u32 %v1154_v44, 16  ;;  %v1810_v47 = vperm.slane %v1716_v15, %v1809_v9  ;;  %v1829_v44 = vadd.s32 4294967240, %v2500_v52 }
 0x7e3   : > { %v1156_v4 = vadd.s32 %v1155_v61, %v1153_v30 }
 0x7e5   : > { %v1405_v0 = vperm.slane %v1156_v4, 0  ;;  %v1406_v18 = vperm.slane %v1156_v4, 1  ;;  %v1407_v23 = vperm.slane %v1156_v4, 2  ;;  %v1408_v35 = vperm.slane %v1156_v4, 3 }
 0x7e6   : > { %v1409_v2 = vperm.slane %v1156_v4, 4  ;;  %v1410_v17 = vperm.slane %v1156_v4, 5  ;;  %v1411_v5 = vperm.slane %v1156_v4, 6  ;;  %v1412_v11 = vperm.slane %v1156_v4, 7 }
 0x7e7   : > { %1784 = vperm.xlu0 %2150, %v3046_v37   ;;  %v1713_v37 = vpop.permute.xlu1 %1712  ;;  %v1725_v13 = vpop.permute.xlu2 %1724 }
 0x7e8   : > { %v1806_v56 = vperm.slane %v1713_v37, %v3076_v21 }
 0x7ef   : > { %1793 = vperm.xlu0 %2150, %v1680_v22   ;;  %v1722_v12 = vpop.permute.xlu1 %1721  ;;  %v1734_v6 = vpop.permute.xlu2 %1733 }
 0x7f0   : > { %v1818_v39 = vperm.slane %v1722_v12, %v3082_v43 }
 0x7f7   : > { %v1728_v34 = vpop.permute.xlu1 %1727  ;;  %v3095_v53 = vpop.permute.xlu2 %1742 }
 0x7ff   : > { %v1737_v16 = vpop.permute.xlu1 %1736  ;;  %v3101_v22 = vpop.permute.xlu2 %1751 }
 0x807   : > { %v3097_v31 = vpop.permute.xlu1 %1745  ;;  %v1761_v33 = vpop.permute.xlu2 %1760 }
 0x808   : > { %v1866_v29 = vperm.slane %v1761_v33, %v3076_v21 }
 0x80e   : > { %v1137_v10 = vpop.xlane.xlu0 %1136 }
 0x80f   : > { %v1138_v58 = vcvt.f32.s32 %v1137_v10  ;;  %v3103_v32 = vpop.permute.xlu1 %1754  ;;  %v1770_v25 = vpop.permute.xlu2 %1769 }
 0x811   : > { %v1141_v55 = vadd.s32 %v1140_v19, %v1138_v58 }
 0x813   : > { %v1397_v42 = vperm.slane %v1141_v55, 0  ;;  %v1398_v63 = vperm.slane %v1141_v55, 1  ;;  %v1399_v27 = vperm.slane %v1141_v55, 2  ;;  %v1400_v51 = vperm.slane %v1141_v55, 3 }
 0x814   : > { %v1401_v57 = vperm.slane %v1141_v55, 4  ;;  %v1402_v24 = vperm.slane %v1141_v55, 5  ;;  %v1403_v36 = vperm.slane %v1141_v55, 6  ;;  %v1404_v59 = vperm.slane %v1141_v55, 7 }
 0x815   : > { %1690 = vst [vmem:[#allocation1] ss:$9 sm:$0xff] %v1397_v42 }
 0x816   : > { %1691 = vst [vmem:[#allocation1 + $0x1] ss:$9 sm:$0xff] %v1398_v63  ;;  %v1821_v63 = vadd.s32 4294967256, %v2500_v52 }
 0x817   : > { %1692 = vst [vmem:[#allocation1 + $0x2] ss:$9 sm:$0xff] %v1399_v27  ;;  %v1764_v46 = vpop.permute.xlu1 %1763 }
 0x818   : > { %1693 = vst [vmem:[#allocation1 + $0x3] ss:$9 sm:$0xff] %v1400_v51  ;;  %v1868_v55 = vperm.slane %v1764_v46, %v1809_v9  ;;  %v1825_v51 = vadd.s32 4294967248, %v2500_v52  ;;  %v1822_v15 = vperm.slane %v1725_v13, %v1821_v63 }
 0x819   : > { %1694 = vst [vmem:[#allocation1 + $0x4] ss:$9 sm:$0xff] %v1401_v57  ;;  %v1872_v57 = vperm.slane %v1770_v25, %v3082_v43  ;;  %v1857_v25 = vadd.s32 4294967184, %v2500_v52 }
 0x81a   : > { %1695 = vst [vmem:[#allocation1 + $0x5] ss:$9 sm:$0xff] %v1402_v24  ;;  %v1779_v24 = vpop.permute.xlu2 %1778 }
 0x81b   : > { %1696 = vst [vmem:[#allocation1 + $0x6] ss:$9 sm:$0xff] %v1403_v36  ;;  %v1878_v12 = vperm.slane %v1779_v24, %v1829_v44 }
 0x81c   : > { %1697 = vst [vmem:[#allocation1 + $0x7] ss:$9 sm:$0xff] %v1404_v59 }
 0x81f   : > { %v1773_v1 = vpop.permute.xlu1 %1772 }
 0x820   : > { %v1874_v30 = vperm.slane %v1773_v1, %v1821_v63 }
 0x821   : > { %v1710_v50 = vpop.permute.xlu0 %1709 }
 0x822   : > { %v1804_v7 = vperm.slane %v1710_v50, %v2500_v52 }
 0x823   : > { %v1698_v26 = vld [vmem:[#allocation1] sm:$0xff] }
 0x824   : > { %1799 = vperm.xlu1 %2151, %v1698_v26   ;;  %1699 = vst [vmem:[#allocation1] ss:$9 sm:$0xff] %v1405_v0  ;;  %v1808_v38 = vsel %vm1807_vm5, %v1806_v56, %v1804_v7  ;;  %v1837_v56 = vadd.s32 4294967224, %v2500_v52  ;;  %v1834_v7 = vperm.slane %v1734_v6, %v1833_v28 }
 0x825   : > { %1700 = vst [vmem:[#allocation1 + $0x1] ss:$9 sm:$0xff] %v1406_v18  ;;  %v1812_v40 = vsel %vm1811_vm6, %v1810_v47, %v1808_v38  ;;  %v1841_v18 = vadd.s32 4294967216, %v2500_v52  ;;  %v1788_v38 = vpop.permute.xlu2 %1787 }
 0x826   : > { %1701 = vst [vmem:[#allocation1 + $0x2] ss:$9 sm:$0xff] %v1407_v23  ;;  %v1816_v8 = vsel %vm1815_vm7, %v1814_v45, %v1812_v40  ;;  %v1838_v40 = vperm.slane %v1737_v16, %v1837_v56 }
 0x827   : > { %1702 = vst [vmem:[#allocation1 + $0x3] ss:$9 sm:$0xff] %v1408_v35  ;;  %v1820_v41 = vsel %vm1819_vm8, %v1818_v39, %v1816_v8  ;;  %v1782_v36 = vpop.permute.xlu1 %1781 }
 0x828   : > { %1703 = vst [vmem:[#allocation1 + $0x4] ss:$9 sm:$0xff] %v1409_v2  ;;  %v1824_v61 = vsel %vm1823_vm9, %v1822_v15, %v1820_v41  ;;  %v1880_v45 = vperm.slane %v1782_v36, %v1833_v28  ;;  %v1845_v2 = vadd.s32 4294967208, %v2500_v52  ;;  %v3207_v15 = vlaneseq }
 0x829   : > { %1704 = vst [vmem:[#allocation1 + $0x5] ss:$9 sm:$0xff] %v1410_v17  ;;  %v1731_v3 = vpop.permute.xlu0 %1730 }
 0x82a   : > { %1705 = vst [vmem:[#allocation1 + $0x6] ss:$9 sm:$0xff] %v1411_v5  ;;  %v1830_v21 = vperm.slane %v1731_v3, %v1829_v44  ;;  %v1853_v3 = vadd.s32 4294967192, %v2500_v52 }
 0x82b   : > { %1706 = vst [vmem:[#allocation1 + $0x7] ss:$9 sm:$0xff] %v1412_v11  ;;  %v1849_v11 = vadd.s32 4294967200, %v2500_v52 }
 0x82f   : > { %v1791_v47 = vpop.permute.xlu1 %1790 }
 0x831   : > { %v3093_v62 = vpop.permute.xlu0 %1739 }
 0x832   : > { %v1707_v54 = vld [vmem:[#allocation1] sm:$0xff]  ;;  %v1842_v35 = vperm.slane %v3093_v62, %v1841_v18  ;;  %v1886_v62 = vperm.slane %v1791_v47, %v1845_v2 }
 0x833   : > { %1802 = vperm.xlu0 %2150, %v1707_v54   ;;  %v1884_v54 = vperm.slane %v1788_v38, %v1841_v18 }
 0x839   : > { %v3099_v20 = vpop.permute.xlu0 %1748 }
 0x83a   : > { %v1854_v33 = vperm.slane %v3099_v20, %v1853_v3 }
 0x841   : > { %v1758_v14 = vpop.permute.xlu0 %1757 }
 0x842   : > { %v1865_v60 = vperm.slane %v1758_v14, %v2500_v52 }
 0x844   : > { %v1867_v19 = vsel %vm1807_vm5, %v1866_v29, %v1865_v60  ;;  %v1797_v60 = vpop.permute.xlu2 %1796  ;;  %vm1901_vm5 = vcmp.lt.s32.totalorder %v3207_v15, 256 }
 0x845   : > { %v1869_v42 = vsel %vm1811_vm6, %v1868_v55, %v1867_v19  ;;  %v1861_v19 = vadd.s32 4294967176, %v2500_v52  ;;  %v1890_v20 = vperm.slane %v1797_v60, %v1853_v3 }
 0x847   : > { %v1862_v52 = vperm.slane %v3103_v32, %v1861_v19 }
 0x849   : > { %v1767_v49 = vpop.permute.xlu0 %1766 }
 0x84a   : > { %v1870_v58 = vperm.slane %v1767_v49, %v3079_v48  ;;  %v1826_v48 = vperm.slane %v1728_v34, %v1825_v51  ;;  %v1846_v34 = vperm.slane %v3095_v53, %v1845_v2  ;;  %v1850_v49 = vperm.slane %v3097_v31, %v1849_v11 }
 0x84b   : > { %v1858_v31 = vperm.slane %v3101_v22, %v1857_v25 }
 0x84c   : > { %v1871_v27 = vsel %vm1815_vm7, %v1870_v58, %v1869_v42  ;;  %v1828_v43 = vsel %vm1827_vm10, %v1826_v48, %v1824_v61 }
 0x84d   : > { %v1873_v37 = vsel %vm1819_vm8, %v1872_v57, %v1871_v27  ;;  %v1832_v0 = vsel %vm1831_vm11, %v1830_v21, %v1828_v43 }
 0x84e   : > { %v1875_v9 = vsel %vm1823_vm9, %v1874_v30, %v1873_v37  ;;  %v1836_v39 = vsel %vm1835_vm12, %v1834_v7, %v1832_v0 }
 0x84f   : > { %v1840_v17 = vsel %vm1839_vm13, %v1838_v40, %v1836_v39 }
 0x850   : > { %v1844_v13 = vsel %vm1843_vm14, %v1842_v35, %v1840_v17 }
 0x851   : > { %v1776_v10 = vpop.permute.xlu0 %1775  ;;  %v1848_v14 = vsel %vm1847_vm15, %v1846_v34, %v1844_v13 }
 0x852   : > { %v1876_v59 = vperm.slane %v1776_v10, %v1825_v51  ;;  %v1852_v1 = vsel %vm1851_vm0, %v1850_v49, %v1848_v14 }
 0x853   : > { %v1856_v58 = vsel %vm1855_vm2, %v1854_v33, %v1852_v1 }
 0x854   : > { %v1877_v50 = vsel %vm1827_vm10, %v1876_v59, %v1875_v9  ;;  %v1860_v27 = vsel %vm1859_vm3, %v1858_v31, %v1856_v58 }
 0x855   : > { %v1879_v26 = vsel %vm1831_vm11, %v1878_v12, %v1877_v50  ;;  %v1864_v36 = vsel %vm1863_vm4, %v1862_v52, %v1860_v27 }
 0x856   : > { %v1881_v8 = vsel %vm1835_vm12, %v1880_v45, %v1879_v26 }
 0x859   : > { %v1785_v4 = vpop.permute.xlu0 %1784 }
 0x85a   : > { %v1882_v23 = vperm.slane %v1785_v4, %v1837_v56 }
 0x85c   : > { %v1883_v41 = vsel %vm1839_vm13, %v1882_v23, %v1881_v8 }
 0x85d   : > { %v1885_v6 = vsel %vm1843_vm14, %v1884_v54, %v1883_v41 }
 0x85e   : > { %v1887_v53 = vsel %vm1847_vm15, %v1886_v62, %v1885_v6 }
 0x861   : > { %v1794_v5 = vpop.permute.xlu0 %1793 }
 0x862   : > { %v1888_v16 = vperm.slane %v1794_v5, %v1849_v11 }
 0x864   : > { %v1889_v29 = vsel %vm1851_vm0, %v1888_v16, %v1887_v53 }
 0x865   : > { %v1891_v42 = vsel %vm1855_vm2, %v1890_v20, %v1889_v29 }
 0x896   : > { %v1800_v46 = vpop.permute.xlu1 %1799 }
 0x897   : > { %v1892_v10 = vperm.slane %v1800_v46, %v1857_v25 }
 0x899   : > { %v1893_v51 = vsel %vm1859_vm3, %v1892_v10, %v1891_v42 }
 0x8a5   : > { %v1803_v55 = vpop.permute.xlu0 %1802 }
 0x8a6   : > { %v1894_v63 = vperm.slane %v1803_v55, %v1861_v19 }
 0x8a8   : > { %v1895_v57 = vsel %vm1863_vm4, %v1894_v63, %v1893_v51 }
 0x8a9   : > { %v1896_v24 = vrot.slane %v1895_v57, 7 }
 0x8ab   : > { %v1898_v22 = vsel %vm1897_vm1, %v1864_v36, %v1896_v24 }
 0x8ac   : > { %1903 = vst.msk [vmem:[%s164_s16] sm:$0x3] %vm1901_vm5, %v1898_v22 }
 0x8ad   : > { %2181 = shalt.err (!%p2178_p3)
}
 0x8ae   : > { %2110 = dma.vmem_to_hbm [thread:$0]  (%p2277_p5), %s1918_s25, 32, %s1920_s26, %s1905_s27  }
 0x8af PF: > { %p2116_p4 = scmp.ge.s32.totalorder %s2216_s15, 2  ;;  %s1931_s8 = sand.u32 1, %s2204_s12  }
 0x8b0   : > { %s1932_s9 = scalar_lea.sflag [#allocation3], %s1931_s8 }
 0x8b1   : > { %p2113_p7 = pnand %p2116_p4, %p2281_p6 }
 0x8b3   : > { %p2114_p8 = pneg %p2113_p7 }
 0x8b5   : > { %2199 = dma.done.wait (%p2114_p8), %s1932_s9, 32  }
 0x8b6   : > { %2201 = vsyncadd (%p2114_p8), %s1932_s9, 4294967264  ;;  %p13_p9 = scmp.ge.s32.totalorder %s2264_s18, 4   ;;  %s3208_s12 = smov %s2208_s13 }
 0x8b7   : > { %s3209_s13 = smov %s2212_s14  ;;  %s3210_s14 = smov %s2275_s21 }
 0x8b8   : > { %s3211_s15 = smov %s2264_s18  ;;  %15 = sbr.rel (!%p13_p9) target bundleno = 3 (0x3), region = 74 }
 0x8bd   :  { %1938 = vsyncpa [#allocation3], 1 }
 0x8be   :  { %1940 = vsyncpa [#allocation3 + $0x1], 1 }

</bundles_post_ra>
